<compile_context>
chip_gen: v6e
topology: v6e:2x2x1
jax: 0.10.0
libtpu: 0.0.40
codegen_flags: <defaults>
</compile_context>

<pallas_src>
import functools

import jax
import jax.numpy as jnp
from jax import lax
from jax.experimental import pallas as pl
from jax.experimental.pallas import tpu as pltpu

EMBEDDING_DIM = 32          # embedding_dim
FEED_NUM = 64               # feed_num (FFN hidden width)
LN_EPS = 1e-5               # nn.LayerNorm default eps
_LANES = 128                # TPU lane width

# tanh-form GELU (EUP-friendly). torch.nn.GELU default is exact erf; deviation <= ~1e-3.
APPROXIMATE_GELU = True
_SQRT_2_OVER_PI = 0.7978845608028654
_GELU_C = 0.044715
_INV_SQRT2 = 0.7071067811865476
_HIGHEST = lax.Precision.HIGHEST
_TARGET_TP = 2048           # packed-row tile target: (2048, 128) f32 == 1 MiB block


def _gelu(h):
    if APPROXIMATE_GELU:
        return 0.5 * h * (1.0 + jnp.tanh(_SQRT_2_OVER_PI * (h + _GELU_C * h * h * h)))
    return 0.5 * h * (1.0 + lax.erf(h * _INV_SQRT2))


def _ffn_kernel(x_ref, w1_ref, b1_ref, w2_ref, b2_ref, gamma_ref, beta_ref,
                gmean_ref, o_ref):
    """One (tp, 128) block of packed tokens -> Linear/GELU/Linear/LayerNorm."""
    # Hoist all operand reads once (constants are small 2-D refs, DMA'd once).
    x = x_ref[...]                 # (tp, P*E) f32, P tokens per lane-dense row
    w1 = w1_ref[...]               # (P*E, P*F) block-diagonal
    b1 = b1_ref[...]               # (1, P*F)
    w2 = w2_ref[...]               # (P*F, P*E) block-diagonal
    b2 = b2_ref[...]               # (1, P*E)
    gamma = gamma_ref[...]         # (1, P*E)
    beta = beta_ref[...]           # (1, P*E)
    gmean = gmean_ref[...]         # (P*E, P*E): 1/E inside each ExE diagonal block

    # Linear1 on the packed layout (block-diagonal weights keep the P token
    # groups independent). f32 operands, f32 accumulation, HIGHEST precision
    # (MXU is <5% utilized here, the extra passes are free).
    h = jnp.dot(x, w1, preferred_element_type=jnp.float32, precision=_HIGHEST) + b1

    # GELU (tanh form -> transcendental goes to the otherwise-idle EUP slot).
    h = _gelu(h)

    # Linear2 (packed).
    y = jnp.dot(h, w2, preferred_element_type=jnp.float32, precision=_HIGHEST) + b2

    # LayerNorm over each E-lane feature group. mean and E[y^2] are two
    # *independent* MXU dots against the block-diagonal averaging matrix
    # (no serial mean -> centered -> var chain, no cross-lane reshapes).
    mean = jnp.dot(y, gmean, preferred_element_type=jnp.float32, precision=_HIGHEST)
    ey2 = jnp.dot(y * y, gmean, preferred_element_type=jnp.float32, precision=_HIGHEST)
    var = jnp.maximum(ey2 - mean * mean, 0.0)
    y_norm = (y - mean) * lax.rsqrt(var + LN_EPS) * gamma + beta

    # Dropout: identity (eval-mode semantics).
    # TODO(synk): training-mode dropout would use pltpu.prng_seed + prng_random_bits.
    o_ref[...] = y_norm.astype(o_ref.dtype)


def _round_up(x, m):
    return ((x + m - 1) // m) * m


@functools.lru_cache(maxsize=1)
def _num_tensorcores():
    """TensorCores per chip (2 on v7x). Conservative fallback: 1 (v5e/v6e)."""
    try:
        info = pltpu.get_tpu_info()
        for name in ("num_cores", "num_tensorcores", "tensorcores_per_chip",
                     "cores_per_chip", "core_count"):
            v = getattr(info, name, None)
            if isinstance(v, int) and v > 0:
                return v
    except Exception:
        pass
    try:
        v = getattr(jax.devices()[0], "num_cores", None)
        if isinstance(v, int) and v > 0:
            return v
    except Exception:
        pass
    return 1


def _choose_tiling(Mp):
    """Pick the packed-row tile (multiple of 8 sublanes, <= Mp) and grid size."""
    if Mp <= 8:
        return Mp, 1                          # one block == full array rows (allowed)
    tp = min(_TARGET_TP, (Mp // 8) * 8)       # ~1 MiB f32 x-block at 2048 rows
    n_tiles = pl.cdiv(Mp, tp)
    if _num_tensorcores() >= 2 and Mp >= 16:
        # Balanced, even tile count so both TensorCores (v7x) get equal-sized work.
        n_even = _round_up(max(n_tiles, 2), 2)
        tp = min(_round_up(pl.cdiv(Mp, n_even), 8), (Mp // 8) * 8)
        n_tiles = pl.cdiv(Mp, tp)
    return tp, n_tiles


def pack_ffn_params(w1, b1, w2, b2, gamma, beta):
    """One-time parameter packing (do this at parameter-load time, not per call)."""
    E, F = w1.shape
    assert _LANES % E == 0, "embedding_dim must divide the 128-lane width"
    P = _LANES // E
    eye = jnp.eye(P, dtype=jnp.float32)
    return dict(
        w1=jnp.kron(eye, w1.astype(jnp.float32)),                        # (P*E, P*F)
        b1=jnp.tile(b1.astype(jnp.float32), P)[None, :],                 # (1, P*F)
        w2=jnp.kron(eye, w2.astype(jnp.float32)),                        # (P*F, P*E)
        b2=jnp.tile(b2.astype(jnp.float32), P)[None, :],                 # (1, P*E)
        gamma=jnp.tile(gamma.astype(jnp.float32), P)[None, :],           # (1, P*E)
        beta=jnp.tile(beta.astype(jnp.float32), P)[None, :],             # (1, P*E)
        gmean=jnp.kron(eye, jnp.full((E, E), 1.0 / E, jnp.float32)),     # (P*E, P*E)
    )


@jax.jit
def feed_forward_packed(x, params):
    """x: (B, S, E) float32 -> (B, S, E) float32, with pre-packed params."""
    B, S, E = x.shape
    PE, PF = params["w1"].shape
    P = PE // E
    M = B * S

    x2d = x.reshape(M, E)
    M_pack = _round_up(M, P)
    if M_pack != M:
        # Tiny (< P rows) pad only so tokens pack P-per-row; no whole-tile padding —
        # the ragged last grid block is handled by Pallas' clipped partial-block DMA.
        x2d = jnp.pad(x2d, ((0, M_pack - M), (0, 0)))
    Mp = M_pack // P
    x_packed = x2d.reshape(Mp, PE)            # free row-major view: (Mp, 128)

    tp, n_tiles = _choose_tiling(Mp)
    const = lambda i: (0, 0)                  # constant block index -> DMA'd once

    out_packed = pl.pallas_call(
        _ffn_kernel,
        out_shape=jax.ShapeDtypeStruct((Mp, PE), x.dtype),
        grid_spec=pltpu.PrefetchScalarGridSpec(
            num_scalar_prefetch=0,
            grid=(n_tiles,),
            in_specs=[
                pl.BlockSpec((tp, PE), lambda i: (i, 0)),   # packed tokens
                pl.BlockSpec((PE, PF), const),              # W1 (block-diag)
                pl.BlockSpec((1, PF), const),               # b1
                pl.BlockSpec((PF, PE), const),              # W2 (block-diag)
                pl.BlockSpec((1, PE), const),               # b2
                pl.BlockSpec((1, PE), const),               # LN gamma
                pl.BlockSpec((1, PE), const),               # LN beta
                pl.BlockSpec((PE, PE), const),              # group-mean matrix
            ],
            out_specs=pl.BlockSpec((tp, PE), lambda i: (i, 0)),
        ),
        compiler_params=pltpu.CompilerParams(
            dimension_semantics=("parallel",),
            vmem_limit_bytes=32 * 1024 * 1024,   # above v5e's 16 MiB scoped default
        ),
    )(x_packed, params["w1"], params["b1"], params["w2"], params["b2"],
      params["gamma"], params["beta"], params["gmean"])

    out = out_packed.reshape(M_pack, E)       # free row-major view back to tokens
    if M_pack != M:
        out = out[:M]
    return out.reshape(B, S, E)


def feed_forward(x, w1, b1, w2, b2, gamma, beta):
    """Convenience wrapper; prefer pack_ffn_params() once + feed_forward_packed()."""
    return feed_forward_packed(x, pack_ffn_params(w1, b1, w2, b2, gamma, beta))


def _reference(x, w1, b1, w2, b2, gamma, beta):
    h = jnp.dot(x, w1, precision=_HIGHEST) + b1
    h = _gelu(h)
    y = jnp.dot(h, w2, precision=_HIGHEST) + b2
    mean = jnp.mean(y, axis=-1, keepdims=True)
    var = jnp.mean((y - mean) ** 2, axis=-1, keepdims=True)
    return (y - mean) * lax.rsqrt(var + LN_EPS) * gamma + beta


if __name__ == "__main__":
    key = jax.random.PRNGKey(0)
    k_x, k_w1, k_b1, k_w2, k_b2 = jax.random.split(key, 5)

    B, S, E, F = 2, 8, EMBEDDING_DIM, FEED_NUM
    x = jax.random.normal(k_x, (B, S, E), dtype=jnp.float32)

    # Deterministic parameter init (uniform, PyTorch-Linear-like scale).
    bound1 = 1.0 / (E ** 0.5)
    bound2 = 1.0 / (F ** 0.5)
    # Stored as (in, out): x @ W == PyTorch's x @ weight.T with weight (out, in).
    w1 = jax.random.uniform(k_w1, (E, F), jnp.float32, -bound1, bound1)
    b1 = jax.random.uniform(k_b1, (F,), jnp.float32, -bound1, bound1)
    w2 = jax.random.uniform(k_w2, (F, E), jnp.float32, -bound2, bound2)
    b2 = jax.random.uniform(k_b2, (E,), jnp.float32, -bound2, bound2)
    gamma = jnp.ones((E,), jnp.float32)   # nn.LayerNorm default weight
    beta = jnp.zeros((E,), jnp.float32)   # nn.LayerNorm default bias

    params = pack_ffn_params(w1, b1, w2, b2, gamma, beta)   # once, at load time
    out = jax.block_until_ready(feed_forward_packed(x, params))

    ref = _reference(x, w1, b1, w2, b2, gamma, beta)
    assert out.shape == (B, S, E)
    assert jnp.allclose(out, ref, atol=1e-3, rtol=1e-3), "mismatch vs reference"

    print("KERNEL_OK")
</pallas_src>

<mosaic_0001>
module attributes {stable_mosaic.version = 11 : i64} {
  func.func @_ffn_kernel(%arg0: i32, %arg1: memref<4x128xf32, #tpu.memory_space<vmem>>, %arg2: memref<128x256xf32, #tpu.memory_space<vmem>>, %arg3: memref<1x256xf32, #tpu.memory_space<vmem>>, %arg4: memref<256x128xf32, #tpu.memory_space<vmem>>, %arg5: memref<1x128xf32, #tpu.memory_space<vmem>>, %arg6: memref<1x128xf32, #tpu.memory_space<vmem>>, %arg7: memref<1x128xf32, #tpu.memory_space<vmem>>, %arg8: memref<128x128xf32, #tpu.memory_space<vmem>>, %arg9: memref<4x128xf32, #tpu.memory_space<vmem>>) attributes {dimension_semantics = [#tpu.dimension_semantics<parallel>], iteration_bounds = array<i64: 1>, scalar_prefetch = 0 : i64, scratch_operands = 0 : i64, tpu.core_type = #tpu.core_type<tc>, window_params = [{transform_indices = @transform_0, window_bounds = array<i64: 4, 128>}, {pipeline_mode = #tpu.pipeline_mode<synchronous>, transform_indices = @transform_1, window_bounds = array<i64: 128, 256>}, {pipeline_mode = #tpu.pipeline_mode<synchronous>, transform_indices = @transform_2, window_bounds = array<i64: 1, 256>}, {pipeline_mode = #tpu.pipeline_mode<synchronous>, transform_indices = @transform_3, window_bounds = array<i64: 256, 128>}, {pipeline_mode = #tpu.pipeline_mode<synchronous>, transform_indices = @transform_4, window_bounds = array<i64: 1, 128>}, {pipeline_mode = #tpu.pipeline_mode<synchronous>, transform_indices = @transform_5, window_bounds = array<i64: 1, 128>}, {pipeline_mode = #tpu.pipeline_mode<synchronous>, transform_indices = @transform_6, window_bounds = array<i64: 1, 128>}, {pipeline_mode = #tpu.pipeline_mode<synchronous>, transform_indices = @transform_7, window_bounds = array<i64: 128, 128>}, {transform_indices = @transform_8, window_bounds = array<i64: 4, 128>}]} {
    %c0 = arith.constant 0 : index
    %c0_0 = arith.constant 0 : index
    %0 = vector.load %arg1[%c0, %c0_0] : memref<4x128xf32, #tpu.memory_space<vmem>>, vector<4x128xf32>
    %c0_1 = arith.constant 0 : index
    %c0_2 = arith.constant 0 : index
    %1 = vector.load %arg2[%c0_1, %c0_2] : memref<128x256xf32, #tpu.memory_space<vmem>>, vector<128x256xf32>
    %c0_3 = arith.constant 0 : index
    %c0_4 = arith.constant 0 : index
    %2 = vector.load %arg3[%c0_3, %c0_4] : memref<1x256xf32, #tpu.memory_space<vmem>>, vector<1x256xf32>
    %c0_5 = arith.constant 0 : index
    %c0_6 = arith.constant 0 : index
    %3 = vector.load %arg4[%c0_5, %c0_6] : memref<256x128xf32, #tpu.memory_space<vmem>>, vector<256x128xf32>
    %c0_7 = arith.constant 0 : index
    %c0_8 = arith.constant 0 : index
    %4 = vector.load %arg5[%c0_7, %c0_8] : memref<1x128xf32, #tpu.memory_space<vmem>>, vector<1x128xf32>
    %c0_9 = arith.constant 0 : index
    %c0_10 = arith.constant 0 : index
    %5 = vector.load %arg6[%c0_9, %c0_10] : memref<1x128xf32, #tpu.memory_space<vmem>>, vector<1x128xf32>
    %c0_11 = arith.constant 0 : index
    %c0_12 = arith.constant 0 : index
    %6 = vector.load %arg7[%c0_11, %c0_12] : memref<1x128xf32, #tpu.memory_space<vmem>>, vector<1x128xf32>
    %c0_13 = arith.constant 0 : index
    %c0_14 = arith.constant 0 : index
    %7 = vector.load %arg8[%c0_13, %c0_14] : memref<128x128xf32, #tpu.memory_space<vmem>>, vector<128x128xf32>
    %cst = arith.constant dense<0.000000e+00> : vector<4x256xf32>
    %8 = tpu.matmul %0, %1, %cst {dimension_numbers = #tpu.dot_dimension_numbers<[1], [0], [0], [1], [0, 0, 1, 1], [], []>, precision = #tpu.contract_precision<fp32>} : vector<4x128xf32>, vector<128x256xf32>, vector<4x256xf32> -> vector<4x256xf32>
    %9 = vector.broadcast %2 : vector<1x256xf32> to vector<4x256xf32>
    %10 = arith.addf %8, %9 : vector<4x256xf32>
    %cst_15 = arith.constant 5.000000e-01 : f32
    %11 = vector.broadcast %cst_15 : f32 to vector<4x256xf32>
    %12 = arith.mulf %11, %10 : vector<4x256xf32>
    %cst_16 = arith.constant 4.471500e-02 : f32
    %13 = vector.broadcast %cst_16 : f32 to vector<4x256xf32>
    %14 = arith.mulf %13, %10 : vector<4x256xf32>
    %15 = arith.mulf %14, %10 : vector<4x256xf32>
    %16 = arith.mulf %15, %10 : vector<4x256xf32>
    %17 = arith.addf %10, %16 : vector<4x256xf32>
    %cst_17 = arith.constant 0.797884583 : f32
    %18 = vector.broadcast %cst_17 : f32 to vector<4x256xf32>
    %19 = arith.mulf %18, %17 : vector<4x256xf32>
    %20 = math.tanh %19 : vector<4x256xf32>
    %cst_18 = arith.constant 1.000000e+00 : f32
    %21 = vector.broadcast %cst_18 : f32 to vector<4x256xf32>
    %22 = arith.addf %21, %20 : vector<4x256xf32>
    %23 = arith.mulf %12, %22 : vector<4x256xf32>
    %cst_19 = arith.constant dense<0.000000e+00> : vector<4x128xf32>
    %24 = tpu.matmul %23, %3, %cst_19 {dimension_numbers = #tpu.dot_dimension_numbers<[1], [0], [0], [1], [0, 0, 1, 1], [], []>, precision = #tpu.contract_precision<fp32>} : vector<4x256xf32>, vector<256x128xf32>, vector<4x128xf32> -> vector<4x128xf32>
    %25 = vector.broadcast %4 : vector<1x128xf32> to vector<4x128xf32>
    %26 = arith.addf %24, %25 : vector<4x128xf32>
    %cst_20 = arith.constant dense<0.000000e+00> : vector<4x128xf32>
    %27 = tpu.matmul %26, %7, %cst_20 {dimension_numbers = #tpu.dot_dimension_numbers<[1], [0], [0], [1], [0, 0, 1, 1], [], []>, precision = #tpu.contract_precision<fp32>} : vector<4x128xf32>, vector<128x128xf32>, vector<4x128xf32> -> vector<4x128xf32>
    %28 = arith.mulf %26, %26 : vector<4x128xf32>
    %cst_21 = arith.constant dense<0.000000e+00> : vector<4x128xf32>
    %29 = tpu.matmul %28, %7, %cst_21 {dimension_numbers = #tpu.dot_dimension_numbers<[1], [0], [0], [1], [0, 0, 1, 1], [], []>, precision = #tpu.contract_precision<fp32>} : vector<4x128xf32>, vector<128x128xf32>, vector<4x128xf32> -> vector<4x128xf32>
    %30 = arith.mulf %27, %27 : vector<4x128xf32>
    %31 = arith.subf %29, %30 : vector<4x128xf32>
    %cst_22 = arith.constant 0.000000e+00 : f32
    %32 = vector.broadcast %cst_22 : f32 to vector<4x128xf32>
    %33 = arith.maximumf %31, %32 : vector<4x128xf32>
    %34 = arith.subf %26, %27 : vector<4x128xf32>
    %cst_23 = arith.constant 9.99999974E-6 : f32
    %35 = vector.broadcast %cst_23 : f32 to vector<4x128xf32>
    %36 = arith.addf %33, %35 : vector<4x128xf32>
    %37 = math.rsqrt %36 : vector<4x128xf32>
    %38 = arith.mulf %34, %37 : vector<4x128xf32>
    %39 = vector.broadcast %5 : vector<1x128xf32> to vector<4x128xf32>
    %40 = arith.mulf %38, %39 : vector<4x128xf32>
    %41 = vector.broadcast %6 : vector<1x128xf32> to vector<4x128xf32>
    %42 = arith.addf %40, %41 : vector<4x128xf32>
    %c0_24 = arith.constant 0 : index
    %c0_25 = arith.constant 0 : index
    %43 = vector.load %arg9[%c0_24, %c0_25] : memref<4x128xf32, #tpu.memory_space<vmem>>, vector<4x128xf32>
    tpu.vector_store %arg9[%c0_24, %c0_25], %42 {strides = array<i32>} : memref<4x128xf32, #tpu.memory_space<vmem>>, vector<4x128xf32>,
    return
  }
  func.func @transform_0(%arg0: i32) -> (i32, i32) {
    %c0_i32 = arith.constant 0 : i32
    %c0_i32_0 = arith.constant 0 : i32
    return %arg0, %c0_i32 : i32, i32
  }
  func.func @transform_1(%arg0: i32) -> (i32, i32) {
    %c0_i32 = arith.constant 0 : i32
    %c0_i32_0 = arith.constant 0 : i32
    %c0_i32_1 = arith.constant 0 : i32
    return %c0_i32, %c0_i32_0 : i32, i32
  }
  func.func @transform_2(%arg0: i32) -> (i32, i32) {
    %c0_i32 = arith.constant 0 : i32
    %c0_i32_0 = arith.constant 0 : i32
    %c0_i32_1 = arith.constant 0 : i32
    return %c0_i32, %c0_i32_0 : i32, i32
  }
  func.func @transform_3(%arg0: i32) -> (i32, i32) {
    %c0_i32 = arith.constant 0 : i32
    %c0_i32_0 = arith.constant 0 : i32
    %c0_i32_1 = arith.constant 0 : i32
    return %c0_i32, %c0_i32_0 : i32, i32
  }
  func.func @transform_4(%arg0: i32) -> (i32, i32) {
    %c0_i32 = arith.constant 0 : i32
    %c0_i32_0 = arith.constant 0 : i32
    %c0_i32_1 = arith.constant 0 : i32
    return %c0_i32, %c0_i32_0 : i32, i32
  }
  func.func @transform_5(%arg0: i32) -> (i32, i32) {
    %c0_i32 = arith.constant 0 : i32
    %c0_i32_0 = arith.constant 0 : i32
    %c0_i32_1 = arith.constant 0 : i32
    return %c0_i32, %c0_i32_0 : i32, i32
  }
  func.func @transform_6(%arg0: i32) -> (i32, i32) {
    %c0_i32 = arith.constant 0 : i32
    %c0_i32_0 = arith.constant 0 : i32
    %c0_i32_1 = arith.constant 0 : i32
    return %c0_i32, %c0_i32_0 : i32, i32
  }
  func.func @transform_7(%arg0: i32) -> (i32, i32) {
    %c0_i32 = arith.constant 0 : i32
    %c0_i32_0 = arith.constant 0 : i32
    %c0_i32_1 = arith.constant 0 : i32
    return %c0_i32, %c0_i32_0 : i32, i32
  }
  func.func @transform_8(%arg0: i32) -> (i32, i32) {
    %c0_i32 = arith.constant 0 : i32
    %c0_i32_0 = arith.constant 0 : i32
    return %arg0, %c0_i32 : i32, i32
  }
}

</mosaic_0001>

<bundles_post_ra>
// kernel: feed_forward_packed.1
= control target key start
LH: loop header
LB: loop body
LE: loop exit
PB: predicated region body
PF: predicated region fallthrough
CT: control target
= control target key end

     0   :  { %13 = vsyncpa [#allocation3], 0  ;;  %s5942_s0 = inlined_call_operand.vmem [shape: f32[4,128], index: 0, kind: input, shape index: {}]   ;;  %s5943_s1 = inlined_call_operand.hbm [shape: f32[128,256], index: 1, kind: input, shape index: {}]   ;;  %s5944_s2 = inlined_call_operand.vmem [shape: f32[1,256], index: 2, kind: input, shape index: {}]   ;;  %s5945_s3 = inlined_call_operand.hbm [shape: f32[256,128], index: 3, kind: input, shape index: {}]   ;;  %s5946_s4 = inlined_call_operand.vmem [shape: f32[1,128], index: 4, kind: input, shape index: {}]   ;;  %s5947_s5 = inlined_call_operand.vmem [shape: f32[1,128], index: 5, kind: input, shape index: {}]   ;;  %s5948_s6 = inlined_call_operand.vmem [shape: f32[1,128], index: 6, kind: input, shape index: {}]   ;;  %s5949_s7 = inlined_call_operand.hbm [shape: f32[128,128], index: 7, kind: input, shape index: {}]   ;;  %s5950_s8 = inlined_call_operand.vmem [shape: f32[4,128], index: 8, kind: output, shape index: {}]  }
   0x1   :  { %14 = vsyncpa [#allocation5], 0  ;;  %s4134_s27 = smov [#allocation4]  }
   0x2   :  { %s36_s28 = sshll.u32 %s4134_s27, 4  ;;  %s37_s28 = int_to_ptr.vmem [resolvable:$true] %s36_s28 }
   0x3   :  { %s4078_s29 = scalar_lea.vmem %s37_s28, 4096  ;;  %p4083_p1 = scmp.lt.s32.totalorder %s37_s28, %s37_s28 }
   0x4   :  { %p4079_p0 = scmp.ne.s32.totalorder %s37_s28, %s4078_s29  ;;  %p4084_p2 = scmp.lt.s32.totalorder %s4078_s29, %s4078_s29 }
   0x6   :  { %p4085_p3 = por %p4084_p2, %p4083_p1 }
   0x8   :  { %p4086_p4 = pnand %p4085_p3, %p4079_p0 }
   0xa   :  { %4089 = shalt.err (!%p4086_p4)
}
   0xb   :  { %s4135_s30 = smov 128   ;;  %s4136_s9 = smov 8  }
   0xc   :  { %42 = dma.hbm_to_vmem [thread:$0]  %s5945_s3, 4096, %s37_s28, [#allocation5], %s4135_s30, %s4135_s30, %s4136_s9  }
   0xd   :  { %s4137_s12 = smov [#allocation2]  }
   0xe   :  { %s22_s13 = sshll.u32 %s4137_s12, 4  ;;  %s23_s13 = int_to_ptr.vmem [resolvable:$true] %s22_s13 }
   0xf   :  { %s4098_s14 = scalar_lea.vmem %s23_s13, 4096  ;;  %p4103_p6 = scmp.lt.s32.totalorder %s23_s13, %s23_s13 }
  0x10   :  { %p4099_p5 = scmp.ne.s32.totalorder %s23_s13, %s4098_s14  ;;  %p4104_p7 = scmp.lt.s32.totalorder %s4098_s14, %s4098_s14 }
  0x12   :  { %p4105_p8 = por %p4104_p7, %p4103_p6 }
  0x14   :  { %p4106_p9 = pnand %p4105_p8, %p4099_p5 }
  0x16   :  { %4109 = shalt.err (!%p4106_p9)
}
  0x17   :  { %s4138_s15 = smov 256   ;;  %s4139_s16 = smov 16  }
  0x18   :  { %28 = dma.hbm_to_vmem [thread:$0]  %s5943_s1, 4096, %s23_s13, [#allocation3], %s4138_s15, %s4138_s15, %s4139_s16  }
  0x19   :  { %s4140_s19 = smov [#allocation6]  }
  0x1a   :  { %s54_s20 = sshll.u32 %s4140_s19, 4  ;;  %s55_s20 = int_to_ptr.vmem [resolvable:$true] %s54_s20 }
  0x1b   :  { %s4118_s3 = scalar_lea.vmem %s55_s20, 2048  ;;  %p4123_p11 = scmp.lt.s32.totalorder %s55_s20, %s55_s20 }
  0x1c   :  { %p4119_p10 = scmp.ne.s32.totalorder %s55_s20, %s4118_s3  ;;  %p4124_p12 = scmp.lt.s32.totalorder %s4118_s3, %s4118_s3 }
  0x1e   :  { %p4125_p13 = por %p4124_p12, %p4123_p11 }
  0x20   :  { %p4126_p0 = pnand %p4125_p13, %p4119_p10 }
  0x22   :  { %4129 = shalt.err (!%p4126_p0)
}
  0x23   :  { %60 = dma.hbm_to_vmem [thread:$0]  %s5949_s7, 2048, %s55_s20, [#allocation5], %s4135_s30, %s4135_s30, %s4136_s9  }
  0x24   :  { %4130 = dma.done.wait [#allocation3], 4096  }
  0x25   :  { %4131 = vsyncadd [#allocation3], 4294963200 }
  0x26   :  { %4132 = dma.done.wait [#allocation5], 6144  }
  0x27   :  { %4133 = vsyncadd [#allocation5], 4294961152  ;;  %v5965_v0 = vmov 0.0   ;;  %v102_v1 = vld [vmem:[#allocation2 + $0xf8] sm:$0xff]  ;;  %v101_v2 = vld [vmem:[#allocation2 + $0xf0] sm:$0xff]  ;;  %vm4142_vm0 = vmmov 0  }
  0x28   :  { %262 = vmatprep.mubr.f32.mxu0 %v5965_v0  ;;  %498 = vmatprep.mubr.f32.mxu1 %v5965_v0  ;;  %v100_v3 = vld [vmem:[#allocation2 + $0xe8] sm:$0xff]  ;;  %v4199_v4 = vand.u32 4294901760, %v102_v1  ;;  %v4201_v5 = vand.u32 4294901760, %v101_v2  ;;  %v99_v7 = vld [vmem:[#allocation2 + $0xe0] sm:$0xff]  ;;  %v98_v8 = vld [vmem:[#allocation2 + $0xd8] sm:$0xff] }
  0x29   :  { %v4203_v6 = vand.u32 4294901760, %v100_v3  ;;  %v97_v9 = vld [vmem:[#allocation2 + $0xd0] sm:$0xff]  ;;  %v4205_v10 = vand.u32 4294901760, %v99_v7  ;;  %v4207_v11 = vand.u32 4294901760, %v98_v8  ;;  %v96_v13 = vld [vmem:[#allocation2 + $0xc8] sm:$0xff]  ;;  %v95_v14 = vld [vmem:[#allocation2 + $0xc0] sm:$0xff] }
  0x2a   :  { %v4209_v12 = vand.u32 4294901760, %v97_v9  ;;  %v94_v15 = vld [vmem:[#allocation2 + $0xb8] sm:$0xff]  ;;  %167 = vmatprep.subr.mxu0 %v4199_v4  ;;  %v4212_v16 = vand.u32 4294901760, %v96_v13  ;;  %v4214_v17 = vand.u32 4294901760, %v95_v14  ;;  %v4219_v19 = vsub.f32 %v102_v1, %v4199_v4  ;;  %v4221_v20 = vld [vmem:[#allocation2 + $0xb0] sm:$0xff]  ;;  %v4223_v21 = vld [vmem:[#allocation2 + $0xa8] sm:$0xff] }
  0x2b   :  { %v4216_v18 = vand.u32 4294901760, %v94_v15  ;;  %v4225_v22 = vld [vmem:[#allocation2 + $0xa0] sm:$0xff]  ;;  %169 = vmatpush1.msra.mxu0 %v4201_v5  ;;  %v4229_v23 = vand.u32 4294901760, %v4221_v20  ;;  %v4232_v24 = vsub.f32 %v101_v2, %v4201_v5  ;;  %v4235_v25 = vand.u32 4294901760, %v4223_v21  ;;  %v4240_v27 = vld [vmem:[#allocation2 + $0x98] sm:$0xff]  ;;  %v4242_v28 = vld [vmem:[#allocation2 + $0x90] sm:$0xff] }
  0x2c   :  { %v4238_v26 = vsub.f32 %v100_v3, %v4203_v6  ;;  %v4244_v29 = vld [vmem:[#allocation2 + $0x88] sm:$0xff]  ;;  %171 = vmatprep.subr.mxu0 %v4203_v6  ;;  %v5963_v30 = vand.u32 4294901760, %v4219_v19  ;;  %v4249_v31 = vand.u32 4294901760, %v4225_v22  ;;  %v4252_v32 = vsub.f32 %v99_v7, %v4205_v10  ;;  %v4266_v38 = vld [vmem:[#allocation2 + $0x80] sm:$0xff]  ;;  %v4290_v47 = vld [vmem:[#allocation2 + $0x78] sm:$0xff] }
  0x2d   :  { %v4255_v33 = vand.u32 4294901760, %v4240_v27  ;;  %173 = vmatpush1.msra.mxu0 %v4205_v10  ;;  %v5962_v34 = vand.u32 4294901760, %v4232_v24  ;;  %v4261_v36 = vsub.f32 %v98_v8, %v4207_v11  ;;  %v4264_v37 = vand.u32 4294901760, %v4242_v28  ;;  %v4300_v52 = vld [vmem:[#allocation2 + $0x70] sm:$0xff]  ;;  %v4307_v57 = vld [vmem:[#allocation2 + $0x68] sm:$0xff]  ;;  %v4319_v62 = vld [vmem:[#allocation2 + $0x60] sm:$0xff] }
  0x2e   :  { %v5960_v35 = vand.u32 4294901760, %v4238_v26  ;;  %175 = vmatprep.subr.mxu0 %v4207_v11  ;;  %v277_v39 = vsub.f32 %v4219_v19, %v5963_v30  ;;  %v5958_v40 = vand.u32 4294901760, %v4252_v32  ;;  %v4274_v41 = vsub.f32 %v97_v9, %v4209_v12  ;;  %v4331_v7 = vld [vmem:[#allocation2 + $0x58] sm:$0xff] }
  0x2f   :  { %6134 = vst [vmem:[#allocation9_spill] sm:$0xff] %v4255_v33  ;;  %6135 = vst [vmem:[#allocation10_spill] sm:$0xff] %v4264_v37  ;;  %v4277_v42 = vand.u32 4294901760, %v4244_v29  ;;  %177 = vmatpush1.msra.mxu0 %v4209_v12  ;;  %v283_v43 = vsub.f32 %v4232_v24, %v5962_v34  ;;  %v5957_v45 = vand.u32 4294901760, %v4261_v36  ;;  %v4288_v46 = vsub.f32 %v96_v13, %v4212_v16  ;;  %v4432_v34 = vld [vmem:[#allocation2 + $0x20] sm:$0xff] }
  0x30   :  { %v289_v44 = vsub.f32 %v4238_v26, %v5960_v35  ;;  %179 = vmatprep.subr.mxu0 %v4212_v16  ;;  %v278_v48 = vand.u32 4294901760, %v277_v39  ;;  %v295_v49 = vsub.f32 %v4252_v32, %v5958_v40  ;;  %v5955_v50 = vand.u32 4294901760, %v4274_v41  ;;  %v4422_v35 = vld [vmem:[#allocation2 + $0x28] sm:$0xff] }
  0x31   :  { %6136 = vst [vmem:[#allocation11_spill] sm:$0xff] %v4277_v42  ;;  %v4298_v51 = vand.u32 4294901760, %v4266_v38  ;;  %181 = vmatpush1.msra.mxu0 %v4214_v17  ;;  %v284_v53 = vand.u32 4294901760, %v283_v43  ;;  %v301_v55 = vsub.f32 %v4261_v36, %v5957_v45  ;;  %v5953_v56 = vand.u32 4294901760, %v4288_v46  ;;  %v4409_v45 = vld [vmem:[#allocation2 + $0x30] sm:$0xff] }
  0x32   :  { %v290_v54 = vand.u32 4294901760, %v289_v44  ;;  %183 = vmatprep.subr.mxu0 %v4216_v18  ;;  %279 = vmatprep.subr.mxu1 %v278_v48  ;;  %v296_v58 = vand.u32 4294901760, %v295_v49  ;;  %v307_v59 = vsub.f32 %v4274_v41, %v5955_v50  ;;  %v4314_v60 = vsub.f32 %v95_v14, %v4214_v17 }
  0x33   :  { %6137 = vst [vmem:[#allocation12_spill] sm:$0xff] %v4298_v51  ;;  %v4317_v61 = vand.u32 4294901760, %v4290_v47  ;;  %185 = vmatpush1.msra.mxu0 %v4229_v23  ;;  %285 = vmatpush1.msra.mxu1 %v284_v53  ;;  %v302_v63 = vand.u32 4294901760, %v301_v55  ;;  %v313_v1 = vsub.f32 %v4288_v46, %v5953_v56  ;;  %v4326_v2 = vsub.f32 %v94_v15, %v4216_v18  ;;  %v4342_v15 = vld [vmem:[#allocation2 + $0x50] sm:$0xff] }
  0x34   :  { %v4329_v3 = vand.u32 4294901760, %v4300_v52  ;;  %187 = vmatprep.subr.mxu0 %v4235_v25  ;;  %291 = vmatprep.subr.mxu1 %v290_v54  ;;  %v308_v8 = vand.u32 4294901760, %v307_v59  ;;  %v5952_v9 = vand.u32 4294901760, %v4314_v60  ;;  %v4337_v13 = vsub.f32 %v4221_v20, %v4229_v23 }
  0x35   :  { %6138 = vst [vmem:[#allocation13_spill] sm:$0xff] %v4317_v61  ;;  %v4340_v14 = vand.u32 4294901760, %v4307_v57  ;;  %189 = vmatpush1.msra.mxu0 %v4249_v31  ;;  %297 = vmatpush1.msra.mxu1 %v296_v58  ;;  %v314_v39 = vand.u32 4294901760, %v313_v1  ;;  %v5951_v43 = vand.u32 4294901760, %v4326_v2  ;;  %v4348_v44 = vsub.f32 %v4223_v21, %v4235_v25  ;;  %v4365_v21 = vld [vmem:[#allocation2 + $0x48] sm:$0xff] }
  0x36   :  { %6139 = vst [vmem:[#allocation14_spill] sm:$0xff] %v4329_v3  ;;  %v4351_v48 = vand.u32 4294901760, %v4319_v62  ;;  %191 = vmatprep.subr.mxu0 %v4255_v33  ;;  %303 = vmatprep.subr.mxu1 %v302_v63  ;;  %v319_v20 = vsub.f32 %v4314_v60, %v5952_v9  ;;  %v5954_v49 = vand.u32 4294901760, %v4337_v13  ;;  %v4360_v53 = vsub.f32 %v4225_v22, %v4249_v31  ;;  %v4388_v9 = vld [vmem:[#allocation2 + $0x40] sm:$0xff] }
  0x37   :  { %6140 = vst [vmem:[#allocation15_spill] sm:$0xff] %v4340_v14  ;;  %v4363_v54 = vand.u32 4294901760, %v4331_v7  ;;  %193 = vmatpush1.msra.mxu0 %v4264_v37  ;;  %309 = vmatpush1.msra.mxu1 %v308_v8  ;;  %v325_v55 = vsub.f32 %v4326_v2, %v5951_v43  ;;  %v5956_v58 = vand.u32 4294901760, %v4348_v44  ;;  %v4374_v59 = vsub.f32 %v4240_v27, %v4255_v33 }
  0x38   :  { %6141 = vst [vmem:[#allocation16_spill] sm:$0xff] %v4351_v48  ;;  %v4377_v22 = vand.u32 4294901760, %v4342_v15  ;;  %195 = vmatprep.subr.mxu0 %v4277_v42  ;;  %315 = vmatprep.subr.mxu1 %v314_v39  ;;  %v320_v63 = vand.u32 4294901760, %v319_v20  ;;  %v331_v1 = vsub.f32 %v4337_v13, %v5954_v49  ;;  %v5959_v8 = vand.u32 4294901760, %v4360_v53  ;;  %v4398_v49 = vld [vmem:[#allocation2 + $0x38] sm:$0xff] }
  0x39   :  { %6142 = vst [vmem:[#allocation17_spill] sm:$0xff] %v4363_v54  ;;  %v4386_v43 = vsub.f32 %v4242_v28, %v4264_v37  ;;  %197 = vmatpush1.msra.mxu0 %v4298_v51  ;;  %v326_v27 = vand.u32 4294901760, %v325_v55  ;;  %v337_v39 = vsub.f32 %v4348_v44, %v5956_v58  ;;  %v5961_v20 = vand.u32 4294901760, %v4374_v59 }
  0x3a   :  { %6143 = vst [vmem:[#allocation18_spill] sm:$0xff] %v4377_v22  ;;  %v4396_v56 = vand.u32 4294901760, %v4365_v21  ;;  %321 = vmatpush1.msra.mxu1 %v320_v63  ;;  %199 = vmatprep.subr.mxu0 %v4317_v61  ;;  %v332_v28 = vand.u32 4294901760, %v331_v1  ;;  %v343_v50 = vsub.f32 %v4360_v53, %v5959_v8  ;;  %v4407_v58 = vsub.f32 %v4244_v29, %v4277_v42 }
  0x3b   :  { %v5964_v55 = vand.u32 4294901760, %v4386_v43  ;;  %327 = vmatprep.subr.mxu1 %v326_v27  ;;  %201 = vmatpush1.msra.mxu0 %v4329_v3  ;;  %v338_v40 = vand.u32 4294901760, %v337_v39  ;;  %v349_v63 = vsub.f32 %v4374_v59, %v5961_v20  ;;  %v4416_v1 = vand.u32 4294901760, %v4388_v9 }
  0x3c   :  { %6144 = vst [vmem:[#allocation19_spill] sm:$0xff] %v4396_v56  ;;  %v4420_v8 = vsub.f32 %v4266_v38, %v4298_v51  ;;  %333 = vmatpush1.msra.mxu1 %v332_v28  ;;  %203 = vmatprep.subr.mxu0 %v4340_v14  ;;  %v344_v29 = vand.u32 4294901760, %v343_v50  ;;  %v5969_v39 = vand.u32 4294901760, %v4407_v58  ;;  %v4430_v20 = vand.u32 4294901760, %v4398_v49 }
  0x3d   :  { %6145 = vst [vmem:[#allocation20_spill] sm:$0xff] %v4416_v1  ;;  %v355_v27 = vsub.f32 %v4386_v43, %v5964_v55  ;;  %339 = vmatprep.subr.mxu1 %v338_v40  ;;  %205 = vmatpush1.msra.mxu0 %v4351_v48  ;;  %v350_v38 = vand.u32 4294901760, %v349_v63  ;;  %v4438_v50 = vsub.f32 %v4290_v47, %v4317_v61  ;;  %v4441_v30 = vand.u32 4294901760, %v4409_v45  ;;  %v4443_v55 = vld [vmem:[#allocation2 + $0x18] sm:$0xff] }
  0x3e   :  { %v5972_v28 = vand.u32 4294901760, %v4420_v8  ;;  %345 = vmatpush1.msra.mxu1 %v344_v29  ;;  %207 = vmatprep.subr.mxu0 %v4363_v54  ;;  %v361_v40 = vsub.f32 %v4407_v58, %v5969_v39  ;;  %v4451_v63 = vsub.f32 %v4300_v52, %v4329_v3  ;;  %v4454_v47 = vand.u32 4294901760, %v4422_v35  ;;  %v4468_v52 = vld [vmem:[#allocation2 + $0x10] sm:$0xff] }
  0x3f   :  { %6146 = vst [vmem:[#allocation21_spill] sm:$0xff] %v4441_v30  ;;  %v356_v0 = vand.u32 4294901760, %v355_v27  ;;  %351 = vmatprep.subr.mxu1 %v350_v38  ;;  %209 = vmatpush1.msra.mxu0 %v4377_v22  ;;  %v4463_v61 = vsub.f32 %v4307_v57, %v4340_v14  ;;  %v4466_v39 = vand.u32 4294901760, %v4432_v34  ;;  %v4477_v27 = vand.u32 4294901760, %v4443_v55  ;;  %v4479_v57 = vld [vmem:[#allocation2 + $0x8] sm:$0xff] }
  0x40   :  { %6147 = vst [vmem:[#allocation22_spill] sm:$0xff] %v4454_v47  ;;  %v367_v29 = vsub.f32 %v4420_v8, %v5972_v28  ;;  %211 = vmatprep.subr.mxu0 %v4396_v56  ;;  %v362_v38 = vand.u32 4294901760, %v361_v40  ;;  %v4474_v28 = vsub.f32 %v4319_v62, %v4351_v48  ;;  %v6149_v51 = vand.u32 4294901760, %v4438_v50  ;;  %v4502_v40 = vld [vmem:[#allocation2] sm:$0xff] }
  0x41   :  { %6148 = vst [vmem:[#allocation23_spill] sm:$0xff] %v4466_v39  ;;  %357 = vmatpush1.msra.mxu1 %v356_v0  ;;  %213 = vmatpush1.msra.mxu0 %v4416_v1  ;;  %v4488_v3 = vsub.f32 %v4331_v7, %v4363_v54  ;;  %v6151_v62 = vand.u32 4294901760, %v4451_v63  ;;  %v4510_v42 = vand.u32 4294901760, %v4479_v57 }
  0x42   :  { %v368_v14 = vand.u32 4294901760, %v367_v29  ;;  %v373_v0 = vsub.f32 %v4438_v50, %v6149_v51  ;;  %363 = vmatprep.subr.mxu1 %v362_v38  ;;  %215 = vmatprep.subr.mxu0 %v4430_v20  ;;  %v4496_v29 = vand.u32 4294901760, %v4468_v52  ;;  %v4500_v51 = vsub.f32 %v4342_v15, %v4377_v22 }
  0x43   :  { %6150 = vst [vmem:[#allocation24_spill] sm:$0xff] %v4488_v3  ;;  %v379_v48 = vsub.f32 %v4451_v63, %v6151_v62  ;;  %217 = vmatpush1.msra.mxu0 %v4441_v30  ;;  %v6153_v38 = vand.u32 4294901760, %v4463_v61  ;;  %v6154_v15 = vand.u32 4294901760, %v4474_v28 }
  0x44   :  { %6152 = vst [vmem:[#allocation25_spill] sm:$0xff] %v4496_v29  ;;  %369 = vmatpush1.msra.mxu1 %v368_v14  ;;  %v374_v7 = vand.u32 4294901760, %v373_v0  ;;  %219 = vmatprep.subr.mxu0 %v4454_v47  ;;  %v4519_v0 = vsub.f32 %v4365_v21, %v4396_v56  ;;  %v4533_v14 = vsub.f32 %v4388_v9, %v4416_v1 }
  0x45   :  { %v385_v54 = vsub.f32 %v4463_v61, %v6153_v38  ;;  %v380_v37 = vand.u32 4294901760, %v379_v48  ;;  %v391_v22 = vsub.f32 %v4474_v28, %v6154_v15  ;;  %v70_v38 = vld [vmem:[%s5942_s0] sm:$0xf]  ;;  %221 = vmatpush1.msra.mxu0 %v4466_v39  ;;  %v6155_v48 = vand.u32 4294901760, %v4488_v3 }
  0x46   :  { %375 = vmatprep.subr.mxu1 %v374_v7  ;;  %v4529_v15 = vand.u32 4294901760, %v4502_v40  ;;  %223 = vmatprep.subr.mxu0 %v4477_v27  ;;  %v6156_v7 = vand.u32 4294901760, %v4500_v51  ;;  %v5993_v56 = vand.u32 4294901760, %v4519_v0  ;;  %v5996_v9 = vand.u32 4294901760, %v4533_v14 }
  0x47   :  { %v386_v62 = vand.u32 4294901760, %v385_v54  ;;  %v397_v33 = vsub.f32 %v4488_v3, %v6155_v48  ;;  %381 = vmatpush1.msra.mxu1 %v380_v37  ;;  %v392_v21 = vand.u32 4294901760, %v391_v22  ;;  %v4542_v48 = vsub.f32 %v4398_v49, %v4430_v20  ;;  %225 = vmatpush1.msra.mxu0 %v4496_v29 }
  0x48   :  { %v403_v54 = vsub.f32 %v4500_v51, %v6156_v7  ;;  %v4546_v37 = vand.u32 4294901760, %v70_v38  ;;  %v4550_v22 = vsub.f32 %v4409_v45, %v4441_v30  ;;  %227 = vmatprep.subr.mxu0 %v4510_v42  ;;  %v409_v49 = vsub.f32 %v4519_v0, %v5993_v56 }
  0x49   :  { %387 = vmatprep.subr.mxu1 %v386_v62  ;;  %v398_v3 = vand.u32 4294901760, %v397_v33  ;;  %v4559_v62 = vsub.f32 %v4422_v35, %v4454_v47  ;;  %229 = vmatpush1.msra.mxu0 %v4529_v15  ;;  %v415_v45 = vsub.f32 %v4533_v14, %v5996_v9  ;;  %v4571_v56 = vsub.f32 %v4432_v34, %v4466_v39 }
  0x4a   :  { %6157 = vst [vmem:[#allocation26_spill] sm:$0xff] %v4546_v37  ;;  %393 = vmatpush1.msra.mxu1 %v392_v21  ;;  %v404_v7 = vand.u32 4294901760, %v403_v54  ;;  %v4566_v21 = vsub.f32 %v70_v38, %v4546_v37  ;;  %v410_v33 = vand.u32 4294901760, %v409_v49  ;;  %v6158_v35 = vand.u32 4294901760, %v4542_v48  ;;  %508 = vmatprep.subr.mxu0 %v4219_v19 }
  0x4b   :  { %399 = vmatprep.subr.mxu1 %v398_v3  ;;  %v6001_v47 = vand.u32 4294901760, %v4559_v62  ;;  %v4580_v38 = vsub.f32 %v4443_v55, %v4477_v27  ;;  %v416_v9 = vand.u32 4294901760, %v415_v45  ;;  %v6159_v34 = vand.u32 4294901760, %v4550_v22 }
  0x4c   :  { %405 = vmatpush1.msra.mxu1 %v404_v7  ;;  %v421_v3 = vsub.f32 %v4542_v48, %v6158_v35  ;;  %v6002_v54 = vand.u32 4294901760, %v4566_v21  ;;  %v6005_v49 = vand.u32 4294901760, %v4571_v56  ;;  %v4593_v55 = vsub.f32 %v4468_v52, %v4496_v29 }
  0x4d   :  { %v427_v7 = vsub.f32 %v4550_v22, %v6159_v34  ;;  %411 = vmatprep.subr.mxu1 %v410_v33  ;;  %v433_v35 = vsub.f32 %v4559_v62, %v6001_v47  ;;  %v6009_v30 = vand.u32 4294901760, %v4580_v38 }
  0x4e   :  { %v422_v39 = vand.u32 4294901760, %v421_v3  ;;  %6160 = vst [vmem:[#allocation27_spill] sm:$0xff] %v4593_v55  ;;  %417 = vmatpush1.msra.mxu1 %v416_v9  ;;  %v266_v45 = vsub.f32 %v4566_v21, %v6002_v54  ;;  %v439_v33 = vsub.f32 %v4571_v56, %v6005_v49  ;;  %v4603_v3 = vsub.f32 %v4479_v57, %v4510_v42 }
  0x4f   :  { %v428_v34 = vand.u32 4294901760, %v427_v7  ;;  %v434_v47 = vand.u32 4294901760, %v433_v35  ;;  %v445_v52 = vsub.f32 %v4580_v38, %v6009_v30  ;;  %v6008_v9 = vand.u32 4294901760, %v4593_v55 }
  0x50   :  { %423 = vmatprep.subr.mxu1 %v422_v39  ;;  %v4611_v54 = vsub.f32 %v4502_v40, %v4529_v15  ;;  %v267_v7 = vand.u32 4294901760, %v266_v45  ;;  %v440_v29 = vand.u32 4294901760, %v439_v33  ;;  %v6007_v49 = vand.u32 4294901760, %v4603_v3 }
  0x51   :  { %429 = vmatpush1.msra.mxu1 %v428_v34  ;;  %v446_v57 = vand.u32 4294901760, %v445_v52  ;;  %v451_v39 = vsub.f32 %v4593_v55, %v6008_v9  ;;  %v6162_v33 = vmov 0.0   ;;  %v6163_v52 = vld [vmem:[#allocation9_spill] sm:$0xff]  ;;  %v6174_v9 = vld [vmem:[#allocation19_spill] sm:$0xff]  ;;  %v6175_v30 = vand.u32 4294901760, %v4219_v19 }
  0x52   :  { %6161 = vst [vmem:[#allocation28_spill] sm:$0xff] %v4611_v54  ;;  %435 = vmatprep.subr.mxu1 %v434_v47  ;;  %v6006_v35 = vand.u32 4294901760, %v4611_v54  ;;  %268 = vmatmul.mubr.f32.vlgmr.msra.gmra.mxu0 %v267_v7  ;;  %v457_v40 = vsub.f32 %v4603_v3, %v6007_v49  ;;  %v6164_v7 = vld [vmem:[#allocation24_spill] sm:$0xff]  ;;  %v6173_v49 = vld [vmem:[#allocation18_spill] sm:$0xff]  ;;  %v6182_v19 = vand.u32 4294901760, %v4261_v36 }
  0x53   :  { %441 = vmatpush1.msra.mxu1 %v440_v29  ;;  %511 = vmatpush1.msra.mxu0 %v4232_v24  ;;  %v452_v45 = vand.u32 4294901760, %v451_v39  ;;  %v6166_v39 = vld [vmem:[#allocation11_spill] sm:$0xff] }
  0x54   :  { %447 = vmatprep.subr.mxu1 %v446_v57  ;;  %v463_v47 = vsub.f32 %v4611_v54, %v6006_v35  ;;  %514 = vmatprep.subr.mxu0 %v4238_v26  ;;  %v458_v34 = vand.u32 4294901760, %v457_v40  ;;  %v6165_v57 = vld [vmem:[#allocation10_spill] sm:$0xff]  ;;  %v6167_v40 = vld [vmem:[#allocation12_spill] sm:$0xff]  ;;  %v6172_v35 = vld [vmem:[#allocation17_spill] sm:$0xff] }
  0x55   :  { %634 = vmatprep.mubr.f32.mxu0 %v6162_v33  ;;  %517 = vmatpush1.msra.mxu0 %v4252_v32 }
  0x56   :  { %453 = vmatpush1.msra.mxu1 %v452_v45  ;;  %v464_v29 = vand.u32 4294901760, %v463_v47  ;;  %520 = vmatprep.subr.mxu0 %v4261_v36  ;;  %v6168_v45 = vld [vmem:[#allocation13_spill] sm:$0xff]  ;;  %v6169_v47 = vld [vmem:[#allocation14_spill] sm:$0xff]  ;;  %v6187_v36 = vand.u32 4294901760, %v4566_v21 }
  0x57   :  { %459 = vmatprep.subr.mxu1 %v458_v34  ;;  %523 = vmatpush1.msra.mxu0 %v4274_v41  ;;  %v6170_v34 = vld [vmem:[#allocation15_spill] sm:$0xff] }
  0x58   :  { %465 = vmatpush1.msra.mxu1 %v464_v29  ;;  %526 = vmatprep.subr.mxu0 %v4288_v46  ;;  %v6171_v29 = vld [vmem:[#allocation16_spill] sm:$0xff] }
  0x59   :  { %500 = vmatmul.mubr.f32.vlgmr.msra.gmra.mxu1 %v4546_v37  ;;  %529 = vmatpush1.msra.mxu0 %v4314_v60  ;;  %v6176_v37 = vld [vmem:[#allocation21_spill] sm:$0xff] }
  0x5a   :  { %644 = vmatprep.subr.mxu1 %v4199_v4  ;;  %532 = vmatprep.subr.mxu0 %v4326_v2 }
  0x5b   :  { %646 = vmatpush1.msra.mxu1 %v4201_v5  ;;  %535 = vmatpush1.msra.mxu0 %v4337_v13 }
  0x5c   :  { %648 = vmatprep.subr.mxu1 %v4203_v6  ;;  %538 = vmatprep.subr.mxu0 %v4348_v44 }
  0x5d   :  { %650 = vmatpush1.msra.mxu1 %v4205_v10  ;;  %541 = vmatpush1.msra.mxu0 %v4360_v53 }
  0x5e   :  { %652 = vmatprep.subr.mxu1 %v4207_v11  ;;  %544 = vmatprep.subr.mxu0 %v4374_v59 }
  0x5f   :  { %654 = vmatpush1.msra.mxu1 %v4209_v12  ;;  %547 = vmatpush1.msra.mxu0 %v4386_v43 }
  0x60   :  { %656 = vmatprep.subr.mxu1 %v4212_v16  ;;  %550 = vmatprep.subr.mxu0 %v4407_v58 }
  0x61   :  { %658 = vmatpush1.msra.mxu1 %v4214_v17  ;;  %553 = vmatpush1.msra.mxu0 %v4420_v8 }
  0x62   :  { %660 = vmatprep.subr.mxu1 %v4216_v18  ;;  %556 = vmatprep.subr.mxu0 %v4438_v50 }
  0x63   :  { %662 = vmatpush1.msra.mxu1 %v4229_v23  ;;  %559 = vmatpush1.msra.mxu0 %v4451_v63 }
  0x64   :  { %664 = vmatprep.subr.mxu1 %v4235_v25  ;;  %562 = vmatprep.subr.mxu0 %v4463_v61 }
  0x65   :  { %666 = vmatpush1.msra.mxu1 %v4249_v31  ;;  %565 = vmatpush1.msra.mxu0 %v4474_v28 }
  0x66   :  { %668 = vmatprep.subr.mxu1 %v6163_v52  ;;  %568 = vmatprep.subr.mxu0 %v6164_v7 }
  0x67   :  { %670 = vmatpush1.msra.mxu1 %v6165_v57  ;;  %571 = vmatpush1.msra.mxu0 %v4500_v51 }
  0x68   :  { %672 = vmatprep.subr.mxu1 %v6166_v39  ;;  %574 = vmatprep.subr.mxu0 %v4519_v0 }
  0x69   :  { %674 = vmatpush1.msra.mxu1 %v6167_v40  ;;  %577 = vmatpush1.msra.mxu0 %v4533_v14 }
  0x6a   :  { %676 = vmatprep.subr.mxu1 %v6168_v45  ;;  %580 = vmatprep.subr.mxu0 %v4542_v48 }
  0x6b   :  { %678 = vmatpush1.msra.mxu1 %v6169_v47  ;;  %583 = vmatpush1.msra.mxu0 %v4550_v22 }
  0x6c   :  { %680 = vmatprep.subr.mxu1 %v6170_v34  ;;  %586 = vmatprep.subr.mxu0 %v4559_v62 }
  0x6d   :  { %682 = vmatpush1.msra.mxu1 %v6171_v29  ;;  %589 = vmatpush1.msra.mxu0 %v4571_v56 }
  0x6e   :  { %684 = vmatprep.subr.mxu1 %v6172_v35  ;;  %592 = vmatprep.subr.mxu0 %v4580_v38 }
  0x6f   :  { %686 = vmatpush1.msra.mxu1 %v6173_v49  ;;  %595 = vmatpush1.msra.mxu0 %v4593_v55  ;;  %v6177_v49 = vand.u32 4294901760, %v4232_v24  ;;  %v6178_v55 = vld [vmem:[#allocation22_spill] sm:$0xff]  ;;  %v6184_v24 = vand.u32 4294901760, %v4274_v41  ;;  %v6189_v41 = vand.u32 4294901760, %v4337_v13  ;;  %v6206_v13 = vand.u32 4294901760, %v4559_v62 }
  0x70   :  { %688 = vmatprep.subr.mxu1 %v6174_v9  ;;  %598 = vmatprep.subr.mxu0 %v4603_v3  ;;  %v6179_v9 = vand.u32 4294901760, %v4238_v26  ;;  %v6185_v26 = vand.u32 4294901760, %v4288_v46  ;;  %v6190_v46 = vand.u32 4294901760, %v4348_v44  ;;  %v6208_v44 = vand.u32 4294901760, %v4580_v38  ;;  %v133_v62 = vld [vmem:[#allocation4 + $0xe8] sm:$0xff] }
  0x71   :  { %690 = vmatpush1.msra.mxu1 %v4416_v1  ;;  %601 = vmatpush1.msra.mxu0 %v4611_v54  ;;  %v6180_v1 = vld [vmem:[#allocation23_spill] sm:$0xff]  ;;  %v6181_v54 = vand.u32 4294901760, %v4252_v32  ;;  %v6186_v32 = vand.u32 4294901760, %v4314_v60  ;;  %v6191_v60 = vand.u32 4294901760, %v4360_v53 }
  0x72   :  { %692 = vmatprep.subr.mxu1 %v4430_v20  ;;  %637 = vmatmul.mubr.f32.vlgmr.msra.gmra.mxu0 %v4566_v21  ;;  %v6209_v53 = vld [vmem:[#allocation27_spill] sm:$0xff] }
  0x73   :  { %752 = vmatprep.subr.mxu0 %v6175_v30  ;;  %694 = vmatpush1.msra.mxu1 %v6176_v37  ;;  %v6183_v30 = vld [vmem:[#allocation25_spill] sm:$0xff] }
  0x74   :  { %756 = vmatpush1.msra.mxu0 %v6177_v49  ;;  %696 = vmatprep.subr.mxu1 %v6178_v55  ;;  %v4813_v49 = vand.u32 4294901760, %v133_v62 }
  0x75   :  { %760 = vmatprep.subr.mxu0 %v6179_v9  ;;  %698 = vmatpush1.msra.mxu1 %v6180_v1 }
  0x76   :  { %764 = vmatpush1.msra.mxu0 %v6181_v54  ;;  %700 = vmatprep.subr.mxu1 %v4477_v27  ;;  %v6188_v54 = vand.u32 4294901760, %v4326_v2  ;;  %v6192_v2 = vand.u32 4294901760, %v4374_v59  ;;  %v6211_v59 = vld [vmem:[#allocation18_spill] sm:$0xff] }
  0x77   :  { %768 = vmatprep.subr.mxu0 %v6182_v19  ;;  %702 = vmatpush1.msra.mxu1 %v6183_v30 }
  0x78   :  { %772 = vmatpush1.msra.mxu0 %v6184_v24  ;;  %704 = vmatprep.subr.mxu1 %v4510_v42 }
  0x79   :  { %776 = vmatprep.subr.mxu0 %v6185_v26  ;;  %706 = vmatpush1.msra.mxu1 %v4529_v15 }
  0x7a   :  { %739 = vmatprep.mubr.f32.mxu1 %v6162_v33  ;;  %780 = vmatpush1.msra.mxu0 %v6186_v32 }
  0x7b   :  { %743 = vmatmul.mubr.f32.vlgmr.msra.gmra.mxu1 %v6187_v36  ;;  %784 = vmatprep.subr.mxu0 %v6188_v54  ;;  %v115_v54 = vld [vmem:[#allocation4 + $0x58] sm:$0xff] }
  0x7c   :  { %918 = vmatprep.subr.mxu1 %v4199_v4  ;;  %788 = vmatpush1.msra.mxu0 %v6189_v41  ;;  %v6193_v4 = vand.u32 4294901760, %v4386_v43  ;;  %v6207_v43 = vand.u32 4294901760, %v4571_v56 }
  0x7d   :  { %920 = vmatpush1.msra.mxu1 %v4201_v5  ;;  %792 = vmatprep.subr.mxu0 %v6190_v46  ;;  %v6194_v5 = vand.u32 4294901760, %v4407_v58  ;;  %v6210_v58 = vand.u32 4294901760, %v6209_v53 }
  0x7e   :  { %922 = vmatprep.subr.mxu1 %v4203_v6  ;;  %796 = vmatpush1.msra.mxu0 %v6191_v60  ;;  %v6195_v6 = vand.u32 4294901760, %v4420_v8  ;;  %v6212_v8 = vand.u32 4294901760, %v4603_v3 }
  0x7f   :  { %924 = vmatpush1.msra.mxu1 %v4205_v10  ;;  %800 = vmatprep.subr.mxu0 %v6192_v2  ;;  %v6196_v10 = vand.u32 4294901760, %v4438_v50  ;;  %v6214_v50 = vld [vmem:[#allocation28_spill] sm:$0xff] }
  0x80   :  { %926 = vmatprep.subr.mxu1 %v4207_v11  ;;  %804 = vmatpush1.msra.mxu0 %v6193_v4  ;;  %v6197_v11 = vand.u32 4294901760, %v4451_v63  ;;  %v6215_v56 = vand.u32 4294901760, %v6214_v50  ;;  %v6216_v63 = vld [vmem:[#allocation20_spill] sm:$0xff]  ;;  %v130_v4 = vld [vmem:[#allocation4 + $0xd0] sm:$0xff] }
  0x81   :  { %928 = vmatpush1.msra.mxu1 %v4209_v12  ;;  %808 = vmatprep.subr.mxu0 %v6194_v5  ;;  %v6198_v12 = vand.u32 4294901760, %v4463_v61  ;;  %v6205_v61 = vand.u32 4294901760, %v4550_v22 }
  0x82   :  { %930 = vmatprep.subr.mxu1 %v4212_v16  ;;  %812 = vmatpush1.msra.mxu0 %v6195_v6  ;;  %v6199_v16 = vand.u32 4294901760, %v4474_v28  ;;  %v6213_v28 = vld [vmem:[#allocation19_spill] sm:$0xff] }
  0x83   :  { %932 = vmatpush1.msra.mxu1 %v4214_v17  ;;  %816 = vmatprep.subr.mxu0 %v6196_v10  ;;  %v6200_v17 = vand.u32 4294901760, %v6164_v7 }
  0x84   :  { %934 = vmatprep.subr.mxu1 %v4216_v18  ;;  %820 = vmatpush1.msra.mxu0 %v6197_v11  ;;  %v6201_v18 = vand.u32 4294901760, %v4500_v51  ;;  %v6217_v51 = vld [vmem:[#allocation26_spill] sm:$0xff] }
  0x85   :  { %936 = vmatpush1.msra.mxu1 %v4229_v23  ;;  %824 = vmatprep.subr.mxu0 %v6198_v12  ;;  %v6202_v23 = vand.u32 4294901760, %v4519_v0  ;;  %v119_v0 = vld [vmem:[#allocation4 + $0x78] sm:$0xff]  ;;  %v114_v12 = vld [vmem:[#allocation4 + $0x50] sm:$0xff] }
  0x86   :  { %938 = vmatprep.subr.mxu1 %v4235_v25  ;;  %828 = vmatpush1.msra.mxu0 %v6199_v16  ;;  %v6203_v25 = vand.u32 4294901760, %v4533_v14  ;;  %v135_v14 = vld [vmem:[#allocation4 + $0xf8] sm:$0xff] }
  0x87   :  { %940 = vmatpush1.msra.mxu1 %v4249_v31  ;;  %832 = vmatprep.subr.mxu0 %v6200_v17  ;;  %v6204_v31 = vand.u32 4294901760, %v4542_v48  ;;  %v4795_v48 = vand.u32 4294901760, %v119_v0 }
  0x88   :  { %942 = vmatprep.subr.mxu1 %v6163_v52  ;;  %836 = vmatpush1.msra.mxu0 %v6201_v18  ;;  %v132_v52 = vld [vmem:[#allocation4 + $0xe0] sm:$0xff] }
  0x89   :  { %944 = vmatpush1.msra.mxu1 %v6165_v57  ;;  %840 = vmatprep.subr.mxu0 %v6202_v23  ;;  %v4869_v23 = vand.u32 4294901760, %v115_v54 }
  0x8a   :  { %946 = vmatprep.subr.mxu1 %v6166_v39  ;;  %844 = vmatpush1.msra.mxu0 %v6203_v25  ;;  %v4828_v39 = vsub.f32 %v133_v62, %v4813_v49  ;;  %v129_v25 = vld [vmem:[#allocation4 + $0xc8] sm:$0xff] }
  0x8b   :  { %948 = vmatpush1.msra.mxu1 %v6167_v40  ;;  %848 = vmatprep.subr.mxu0 %v6204_v31  ;;  %v4830_v40 = vand.u32 4294901760, %v132_v52 }
  0x8c   :  { %950 = vmatprep.subr.mxu1 %v6168_v45  ;;  %852 = vmatpush1.msra.mxu0 %v6205_v61  ;;  %v116_v45 = vld [vmem:[#allocation4 + $0x60] sm:$0xff]  ;;  %v6027_v32 = vand.u32 4294901760, %v4828_v39 }
  0x8d   :  { %952 = vmatpush1.msra.mxu1 %v6169_v47  ;;  %856 = vmatprep.subr.mxu0 %v6206_v13  ;;  %v4840_v19 = vand.u32 4294901760, %v116_v45  ;;  %v4848_v36 = vsub.f32 %v132_v52, %v4830_v40 }
  0x8e   :  { %954 = vmatprep.subr.mxu1 %v6170_v34  ;;  %860 = vmatpush1.msra.mxu0 %v6207_v43  ;;  %v1287_v6 = vsub.f32 %v4828_v39, %v6027_v32  ;;  %v4877_v43 = vand.u32 4294901760, %v130_v4 }
  0x8f   :  { %956 = vmatpush1.msra.mxu1 %v6171_v29  ;;  %864 = vmatprep.subr.mxu0 %v6208_v44  ;;  %v4856_v2 = vsub.f32 %v116_v45, %v4840_v19  ;;  %v6025_v10 = vand.u32 4294901760, %v4848_v36  ;;  %v113_v44 = vld [vmem:[#allocation4 + $0x48] sm:$0xff] }
  0x90   :  { %958 = vmatprep.subr.mxu1 %v6172_v35  ;;  %868 = vmatpush1.msra.mxu0 %v6210_v58  ;;  %v1288_v31 = vand.u32 4294901760, %v1287_v6  ;;  %v4900_v62 = vand.u32 4294901760, %v113_v44  ;;  %v111_v6 = vld [vmem:[#allocation4 + $0x38] sm:$0xff] }
  0x91   :  { %960 = vmatpush1.msra.mxu1 %v6211_v59  ;;  %872 = vmatprep.subr.mxu0 %v6212_v8  ;;  %v6023_v18 = vand.u32 4294901760, %v4856_v2  ;;  %v1294_v61 = vsub.f32 %v4848_v36, %v6025_v10  ;;  %v4884_v59 = vsub.f32 %v115_v54, %v4869_v23  ;;  %v4886_v8 = vand.u32 4294901760, %v114_v12  ;;  %v127_v54 = vld [vmem:[#allocation4 + $0xb8] sm:$0xff] }
  0x92   :  { %962 = vmatprep.subr.mxu1 %v6213_v28  ;;  %876 = vmatpush1.msra.mxu0 %v6215_v56  ;;  %v128_v28 = vld [vmem:[#allocation4 + $0xc0] sm:$0xff]  ;;  %v123_v10 = vld [vmem:[#allocation4 + $0x98] sm:$0xff] }
  0x93   :  { %909 = vmatprep.mubr.f32.mxu0 %v6162_v33  ;;  %964 = vmatpush1.msra.mxu1 %v6216_v63  ;;  %v1182_v58 = vsub.f32 %v4856_v2, %v6023_v18  ;;  %v1295_v50 = vand.u32 4294901760, %v1294_v61  ;;  %v4891_v63 = vsub.f32 %v130_v4, %v4877_v43  ;;  %v4910_v45 = vand.u32 4294901760, %v128_v28 }
  0x94   :  { %911 = vmatmul.mubr.f32.vlgmr.msra.gmra.mxu0 %v6217_v51  ;;  %966 = vmatprep.subr.mxu1 %v4430_v20  ;;  %v4793_v20 = vand.u32 4294901760, %v135_v14 }
  0x95   :  { %1013 = vmatprep.mubr.f32.mxu1 %v6162_v33  ;;  %968 = vmatpush1.msra.mxu1 %v6176_v37  ;;  %v134_v37 = vld [vmem:[#allocation4 + $0xf0] sm:$0xff]  ;;  %v6019_v52 = vand.u32 4294901760, %v4891_v63 }
  0x96   :  { %970 = vmatprep.subr.mxu1 %v6178_v55  ;;  %6218 = vst [vmem:[#allocation9_spill] sm:$0xff] %v4793_v20  ;;  %v4798_v22 = vsub.f32 %v135_v14, %v4793_v20  ;;  %3221 = vmatprep.subr.mxu0 %v4793_v20  ;;  %v117_v55 = vld [vmem:[#allocation4 + $0x68] sm:$0xff]  ;;  %v112_v14 = vld [vmem:[#allocation4 + $0x40] sm:$0xff]  ;;  %v106_v33 = vld [vmem:[#allocation4 + $0x10] sm:$0xff] }
  0x97   :  { %972 = vmatpush1.msra.mxu1 %v6180_v1  ;;  %v4800_v1 = vand.u32 4294901760, %v134_v37  ;;  %3222 = vmatpush3.msra.mxu0 %v4795_v48  ;;  %v4820_v35 = vand.u32 4294901760, %v117_v55 }
  0x98   :  { %974 = vmatprep.subr.mxu1 %v4477_v27  ;;  %6219 = vst [vmem:[#allocation24_spill] sm:$0xff] %v4798_v22  ;;  %v118_v27 = vld [vmem:[#allocation4 + $0x70] sm:$0xff]  ;;  %v6033_v21 = vand.u32 4294901760, %v4798_v22 }
  0x99   :  { %976 = vmatpush1.msra.mxu1 %v6183_v30  ;;  %v4811_v38 = vsub.f32 %v134_v37, %v4800_v1  ;;  %3223 = vmatprep.subr.mxu0 %v4800_v1  ;;  %v4838_v29 = vsub.f32 %v117_v55, %v4820_v35  ;;  %v131_v30 = vld [vmem:[#allocation4 + $0xd8] sm:$0xff]  ;;  %v6020_v37 = vand.u32 4294901760, %v4884_v59 }
  0x9a   :  { %978 = vmatprep.subr.mxu1 %v4510_v42  ;;  %v4804_v42 = vsub.f32 %v119_v0, %v4795_v48  ;;  %v1273_v7 = vsub.f32 %v4798_v22, %v6033_v21  ;;  %v4863_v11 = vand.u32 4294901760, %v131_v30  ;;  %v1183_v0 = vand.u32 4294901760, %v1182_v58 }
  0x9b   :  { %980 = vmatpush1.msra.mxu1 %v4529_v15  ;;  %v4806_v15 = vand.u32 4294901760, %v118_v27  ;;  %v6030_v57 = vand.u32 4294901760, %v4811_v38  ;;  %v6026_v60 = vand.u32 4294901760, %v4838_v29  ;;  %v4943_v58 = vand.u32 4294901760, %v127_v54 }
  0x9c   :  { %1015 = vmatmul.mubr.f32.vlgmr.msra.gmra.mxu1 %v6217_v51  ;;  %v6031_v3 = vand.u32 4294901760, %v4804_v42  ;;  %v1274_v24 = vand.u32 4294901760, %v1273_v7  ;;  %v4875_v13 = vsub.f32 %v131_v30, %v4863_v11  ;;  %v4893_v51 = vand.u32 4294901760, %v129_v25 }
  0x9d   :  { %v4818_v9 = vsub.f32 %v118_v27, %v4806_v15  ;;  %3224 = vmatpush3.msra.mxu0 %v4806_v15  ;;  %v1280_v26 = vsub.f32 %v4811_v38, %v6030_v57  ;;  %v1175_v17 = vsub.f32 %v4838_v29, %v6026_v60  ;;  %v4898_v27 = vsub.f32 %v114_v12, %v4886_v8 }
  0x9e   :  { %3225 = vmatprep.subr.mxu0 %v4813_v49  ;;  %v1161_v47 = vsub.f32 %v4804_v42, %v6031_v3  ;;  %3256 = vmatprep.subr.mxu1 %v1274_v24  ;;  %v6022_v56 = vand.u32 4294901760, %v4875_v13  ;;  %v4908_v7 = vsub.f32 %v129_v25, %v4893_v51  ;;  %v4918_v24 = vsub.f32 %v113_v44, %v4900_v62  ;;  %v122_v3 = vld [vmem:[#allocation4 + $0x90] sm:$0xff] }
  0x9f   :  { %v6029_v34 = vand.u32 4294901760, %v4818_v9  ;;  %3226 = vmatpush3.msra.mxu0 %v4820_v35  ;;  %v1281_v5 = vand.u32 4294901760, %v1280_v26  ;;  %v1176_v53 = vand.u32 4294901760, %v1175_v17  ;;  %v6017_v30 = vand.u32 4294901760, %v4898_v27 }
  0xa0   :  { %3227 = vmatprep.subr.mxu0 %v4830_v40  ;;  %v1162_v41 = vand.u32 4294901760, %v1161_v47  ;;  %v1301_v55 = vsub.f32 %v4875_v13, %v6022_v56  ;;  %v1189_v47 = vsub.f32 %v4884_v59, %v6020_v37  ;;  %v4920_v26 = vand.u32 4294901760, %v112_v14 }
  0xa1   :  { %v1168_v46 = vsub.f32 %v4818_v9, %v6029_v34  ;;  %3228 = vmatpush3.msra.mxu0 %v4840_v19  ;;  %v6015_v4 = vand.u32 4294901760, %v4908_v7  ;;  %v6016_v17 = vand.u32 4294901760, %v4918_v24  ;;  %v5023_v21 = vand.u32 4294901760, %v123_v10 }
  0xa2   :  { %3257 = vmatpush3.msra.mxu1 %v1162_v41  ;;  %3229 = vmatprep.subr.mxu0 %v4863_v11  ;;  %v1302_v41 = vand.u32 4294901760, %v1301_v55  ;;  %v1190_v12 = vand.u32 4294901760, %v1189_v47  ;;  %v4936_v25 = vsub.f32 %v112_v14, %v4920_v26  ;;  %v4949_v55 = vand.u32 4294901760, %v111_v6  ;;  %v125_v47 = vld [vmem:[#allocation4 + $0xa8] sm:$0xff] }
  0xa3   :  { %v1169_v16 = vand.u32 4294901760, %v1168_v46  ;;  %3258 = vmatprep.subr.mxu1 %v1281_v5  ;;  %3230 = vmatpush3.msra.mxu0 %v4869_v23  ;;  %v1308_v46 = vsub.f32 %v4891_v63, %v6019_v52  ;;  %v4928_v5 = vsub.f32 %v128_v28, %v4910_v45  ;;  %v1315_v44 = vsub.f32 %v4908_v7, %v6015_v4  ;;  %v110_v28 = vld [vmem:[#allocation4 + $0x30] sm:$0xff] }
  0xa4   :  { %3231 = vmatprep.subr.mxu0 %v4877_v43  ;;  %v1203_v14 = vsub.f32 %v4918_v24, %v6016_v17  ;;  %v4955_v4 = vsub.f32 %v127_v54, %v4943_v58  ;;  %6229 = vst [vmem:[#allocation22_spill] sm:$0xff] %v5023_v21 }
  0xa5   :  { %3259 = vmatpush3.msra.mxu1 %v1169_v16  ;;  %3232 = vmatpush3.msra.mxu0 %v4886_v8  ;;  %v1196_v16 = vsub.f32 %v4898_v27, %v6017_v30  ;;  %v1309_v61 = vand.u32 4294901760, %v1308_v46 }
  0xa6   :  { %3260 = vmatprep.subr.mxu1 %v1288_v31  ;;  %3233 = vmatprep.subr.mxu0 %v4893_v51  ;;  %v126_v31 = vld [vmem:[#allocation4 + $0xb0] sm:$0xff]  ;;  %6220 = vst [vmem:[#allocation10_spill] sm:$0xff] %v4955_v4  ;;  %v1204_v17 = vand.u32 4294901760, %v1203_v14  ;;  %v6024_v52 = vand.u32 4294901760, %v4955_v4  ;;  %v108_v14 = vld [vmem:[#allocation4 + $0x20] sm:$0xff] }
  0xa7   :  { %3261 = vmatpush3.msra.mxu1 %v1176_v53  ;;  %3234 = vmatpush3.msra.mxu0 %v4900_v62  ;;  %v6018_v53 = vand.u32 4294901760, %v4928_v5 }
  0xa8   :  { %3262 = vmatprep.subr.mxu1 %v1295_v50  ;;  %3235 = vmatprep.subr.mxu0 %v4910_v45  ;;  %v1197_v50 = vand.u32 4294901760, %v1196_v16  ;;  %v109_v16 = vld [vmem:[#allocation4 + $0x28] sm:$0xff] }
  0xa9   :  { %3263 = vmatpush3.msra.mxu1 %v1183_v0  ;;  %3236 = vmatpush3.msra.mxu0 %v4920_v26  ;;  %v6021_v0 = vand.u32 4294901760, %v4936_v25  ;;  %v1322_v46 = vsub.f32 %v4928_v5, %v6018_v53  ;;  %v124_v53 = vld [vmem:[#allocation4 + $0xa0] sm:$0xff]  ;;  %v4980_v18 = vand.u32 4294901760, %v109_v16 }
  0xaa   :  { %3264 = vmatprep.subr.mxu1 %v1302_v41  ;;  %v1316_v41 = vand.u32 4294901760, %v1315_v44  ;;  %3237 = vmatprep.subr.mxu0 %v4943_v58  ;;  %v4966_v44 = vand.u32 4294901760, %v110_v28 }
  0xab   :  { %3265 = vmatpush3.msra.mxu1 %v1190_v12  ;;  %v4957_v12 = vand.u32 4294901760, %v126_v31  ;;  %v1210_v30 = vsub.f32 %v4936_v25, %v6021_v0  ;;  %3238 = vmatpush3.msra.mxu0 %v4949_v55  ;;  %v1323_v54 = vand.u32 4294901760, %v1322_v46 }
  0xac   :  { %3266 = vmatprep.subr.mxu1 %v1309_v61  ;;  %v4964_v61 = vsub.f32 %v111_v6, %v4949_v55  ;;  %v4978_v56 = vsub.f32 %v110_v28, %v4966_v44 }
  0xad   :  { %3267 = vmatpush3.msra.mxu1 %v1197_v50  ;;  %v4971_v37 = vsub.f32 %v126_v31, %v4957_v12  ;;  %v4973_v50 = vand.u32 4294901760, %v125_v47  ;;  %3239 = vmatprep.subr.mxu0 %v4957_v12  ;;  %v1211_v6 = vand.u32 4294901760, %v1210_v30  ;;  %v1329_v31 = vsub.f32 %v4955_v4, %v6024_v52 }
  0xae   :  { %6221 = vst [vmem:[#allocation11_spill] sm:$0xff] %v4964_v61  ;;  %3268 = vmatprep.subr.mxu1 %v1316_v41  ;;  %v6028_v0 = vand.u32 4294901760, %v4964_v61  ;;  %6223 = vst [vmem:[#allocation13_spill] sm:$0xff] %v4978_v56  ;;  %3240 = vmatpush3.msra.mxu0 %v4966_v44  ;;  %v4990_v30 = vand.u32 4294901760, %v124_v53  ;;  %v6035_v28 = vand.u32 4294901760, %v4978_v56  ;;  %v5000_v52 = vand.u32 4294901760, %v108_v14 }
  0xaf   :  { %6222 = vst [vmem:[#allocation12_spill] sm:$0xff] %v4971_v37  ;;  %3269 = vmatpush3.msra.mxu1 %v1204_v17  ;;  %v6032_v41 = vand.u32 4294901760, %v4971_v37  ;;  %v4988_v46 = vsub.f32 %v125_v47, %v4973_v50  ;;  %3241 = vmatprep.subr.mxu0 %v4973_v50  ;;  %v1330_v47 = vand.u32 4294901760, %v1329_v31 }
  0xb0   :  { %3270 = vmatprep.subr.mxu1 %v1323_v54  ;;  %v1217_v17 = vsub.f32 %v4964_v61, %v6028_v0  ;;  %v4998_v54 = vsub.f32 %v109_v16, %v4980_v18  ;;  %6226 = vst [vmem:[#allocation16_spill] sm:$0xff] %v5000_v52  ;;  %3242 = vmatpush3.msra.mxu0 %v4980_v18  ;;  %v107_v0 = vld [vmem:[#allocation4 + $0x18] sm:$0xff] }
  0xb1   :  { %6224 = vst [vmem:[#allocation14_spill] sm:$0xff] %v4988_v46  ;;  %3271 = vmatpush3.msra.mxu1 %v1211_v6  ;;  %v1336_v60 = vsub.f32 %v4971_v37, %v6032_v41  ;;  %v6040_v6 = vand.u32 4294901760, %v4988_v46  ;;  %v5008_v32 = vsub.f32 %v124_v53, %v4990_v30  ;;  %3243 = vmatprep.subr.mxu0 %v4990_v30  ;;  %v5029_v37 = vand.u32 4294901760, %v107_v0 }
  0xb2   :  { %6225 = vst [vmem:[#allocation15_spill] sm:$0xff] %v4998_v54  ;;  %v1218_v16 = vand.u32 4294901760, %v1217_v17  ;;  %v1224_v34 = vsub.f32 %v4978_v56, %v6035_v28  ;;  %v6043_v57 = vand.u32 4294901760, %v4998_v54  ;;  %v5016_v31 = vsub.f32 %v108_v14, %v5000_v52  ;;  %3244 = vmatpush3.msra.mxu0 %v5000_v52  ;;  %3272 = vmatprep.subr.mxu1 %v1330_v47 }
  0xb3   :  { %6227 = vst [vmem:[#allocation17_spill] sm:$0xff] %v5008_v32  ;;  %v1337_v41 = vand.u32 4294901760, %v1336_v60  ;;  %v1343_v53 = vsub.f32 %v4988_v46, %v6040_v6  ;;  %v6046_v17 = vand.u32 4294901760, %v5008_v32  ;;  %6230 = vst [vmem:[#allocation23_spill] sm:$0xff] %v5029_v37  ;;  %v121_v60 = vld [vmem:[#allocation4 + $0x88] sm:$0xff]  ;;  %v5035_v46 = vsub.f32 %v123_v10, %v5023_v21  ;;  %3245 = vmatprep.subr.mxu0 %v5023_v21 }
  0xb4   :  { %6228 = vst [vmem:[#allocation21_spill] sm:$0xff] %v5016_v31  ;;  %3273 = vmatpush3.msra.mxu1 %v1218_v16  ;;  %v1225_v28 = vand.u32 4294901760, %v1224_v34  ;;  %v1231_v14 = vsub.f32 %v4998_v54, %v6043_v57  ;;  %v6051_v56 = vand.u32 4294901760, %v5016_v31  ;;  %v5037_v16 = vand.u32 4294901760, %v122_v3  ;;  %v105_v34 = vld [vmem:[#allocation4 + $0x8] sm:$0xff]  ;;  %3246 = vmatpush3.msra.mxu0 %v5029_v37 }
  0xb5   :  { %3274 = vmatprep.subr.mxu1 %v1337_v41  ;;  %v1344_v47 = vand.u32 4294901760, %v1343_v53  ;;  %v1350_v6 = vsub.f32 %v5008_v32, %v6046_v17  ;;  %6231 = vst [vmem:[#allocation25_spill] sm:$0xff] %v5035_v46  ;;  %v5044_v41 = vsub.f32 %v107_v0, %v5029_v37  ;;  %v5046_v53 = vand.u32 4294901760, %v106_v33  ;;  %v120_v17 = vld [vmem:[#allocation4 + $0x80] sm:$0xff] }
  0xb6   :  { %6232 = vst [vmem:[#allocation27_spill] sm:$0xff] %v5037_v16  ;;  %3275 = vmatpush3.msra.mxu1 %v1225_v28  ;;  %v1232_v57 = vand.u32 4294901760, %v1231_v14  ;;  %v1238_v54 = vsub.f32 %v5016_v31, %v6051_v56  ;;  %v6056_v32 = vand.u32 4294901760, %v5035_v46  ;;  %v5051_v61 = vsub.f32 %v122_v3, %v5037_v16  ;;  %v104_v14 = vld [vmem:[#allocation4] sm:$0xff]  ;;  %3247 = vmatprep.subr.mxu0 %v5037_v16 }
  0xb7   :  { %6233 = vst [vmem:[#allocation18_spill] sm:$0xff] %v5044_v41  ;;  %6234 = vst [vmem:[#allocation19_spill] sm:$0xff] %v5046_v53  ;;  %3276 = vmatprep.subr.mxu1 %v1344_v47  ;;  %v1351_v10 = vand.u32 4294901760, %v1350_v6  ;;  %v5053_v28 = vand.u32 4294901760, %v121_v60  ;;  %v6061_v56 = vand.u32 4294901760, %v5044_v41  ;;  %v5058_v31 = vsub.f32 %v106_v33, %v5046_v53  ;;  %3248 = vmatpush3.msra.mxu0 %v5046_v53 }
  0xb8   :  { %6235 = vst [vmem:[#allocation28_spill] sm:$0xff] %v5051_v61  ;;  %3277 = vmatpush3.msra.mxu1 %v1232_v57  ;;  %v1239_v0 = vand.u32 4294901760, %v1238_v54  ;;  %v5060_v37 = vand.u32 4294901760, %v105_v34  ;;  %v1357_v3 = vsub.f32 %v5035_v46, %v6056_v32  ;;  %v6064_v6 = vand.u32 4294901760, %v5051_v61 }
  0xb9   :  { %6236 = vst [vmem:[#allocation20_spill] sm:$0xff] %v5053_v28  ;;  %6237 = vst [vmem:[#allocation26_spill] sm:$0xff] %v5058_v31  ;;  %3278 = vmatprep.subr.mxu1 %v1351_v10  ;;  %v5068_v47 = vsub.f32 %v121_v60, %v5053_v28  ;;  %v5070_v57 = vand.u32 4294901760, %v120_v17  ;;  %3249 = vmatprep.subr.mxu0 %v5053_v28  ;;  %v1245_v33 = vsub.f32 %v5044_v41, %v6061_v56 }
  0xba   :  { %6238 = vst [vmem:[#allocation29_spill] sm:$0xff] %v5060_v37  ;;  %3279 = vmatpush3.msra.mxu1 %v1239_v0  ;;  %v6067_v54 = vand.u32 4294901760, %v5058_v31  ;;  %v5078_v10 = vsub.f32 %v105_v34, %v5060_v37  ;;  %v5080_v32 = vand.u32 4294901760, %v104_v14  ;;  %3250 = vmatpush3.msra.mxu0 %v5060_v37  ;;  %v1358_v60 = vand.u32 4294901760, %v1357_v3 }
  0xbb   :  { %6239 = vst [vmem:[#allocation30_spill] sm:$0xff] %v5068_v47  ;;  %6240 = vst [vmem:[#allocation31_spill] sm:$0xff] %v5070_v57  ;;  %v1364_v46 = vsub.f32 %v5051_v61, %v6064_v6  ;;  %v6070_v0 = vand.u32 4294901760, %v5068_v47  ;;  %v5088_v28 = vsub.f32 %v120_v17, %v5070_v57  ;;  %3251 = vmatprep.subr.mxu0 %v5070_v57  ;;  %v1246_v56 = vand.u32 4294901760, %v1245_v33 }
  0xbc   :  { %6241 = vst [vmem:[#allocation32_spill] sm:$0xff] %v5078_v10  ;;  %6242 = vst [vmem:[#allocation33_spill] sm:$0xff] %v5080_v32  ;;  %v1252_v34 = vsub.f32 %v5058_v31, %v6067_v54  ;;  %v6071_v41 = vand.u32 4294901760, %v5078_v10  ;;  %v5096_v3 = vsub.f32 %v104_v14, %v5080_v32  ;;  %3252 = vmatpush3.msra.mxu0 %v5080_v32  ;;  %3280 = vmatprep.subr.mxu1 %v1358_v60 }
  0xbd   :  { %6243 = vst [vmem:[#allocation34_spill] sm:$0xff] %v5088_v28  ;;  %v1365_v6 = vand.u32 4294901760, %v1364_v46  ;;  %v1371_v17 = vsub.f32 %v5068_v47, %v6070_v0  ;;  %v6072_v61 = vand.u32 4294901760, %v5088_v28  ;;  %3291 = vmatprep.subr.mxu0 %v4798_v22  ;;  %3281 = vmatpush3.msra.mxu1 %v1246_v56 }
  0xbe   :  { %6244 = vst [vmem:[#allocation35_spill] sm:$0xff] %v5096_v3  ;;  %v1253_v33 = vand.u32 4294901760, %v1252_v34  ;;  %v1259_v54 = vsub.f32 %v5078_v10, %v6071_v41  ;;  %v6076_v14 = vand.u32 4294901760, %v5096_v3 }
  0xbf   :  { %3282 = vmatprep.subr.mxu1 %v1365_v6  ;;  %v1372_v31 = vand.u32 4294901760, %v1371_v17  ;;  %v1378_v46 = vsub.f32 %v5088_v28, %v6072_v61  ;;  %v156_v6 = vlaneseq }
  0xc0   :  { %3283 = vmatpush3.msra.mxu1 %v1253_v33  ;;  %v1260_v60 = vand.u32 4294901760, %v1259_v54  ;;  %v1266_v0 = vsub.f32 %v5096_v3, %v6076_v14  ;;  %v103_v33 = vld [vmem:[%s5944_s2] sm:$0x3] }
  0xc1   :  { %3284 = vmatprep.subr.mxu1 %v1372_v31  ;;  %v1379_v56 = vand.u32 4294901760, %v1378_v46  ;;  %v157_v17 = vshrl.u32 %v156_v6, 7 }
  0xc2   :  { %3285 = vmatpush3.msra.mxu1 %v1260_v60  ;;  %v1267_v34 = vand.u32 4294901760, %v1266_v0 }
  0xc3   :  { %3286 = vmatprep.subr.mxu1 %v1379_v56  ;;  %v158_v41 = vsub.s32 0, %v157_v17  ;;  %v162_v61 = vsub.s32 1, %v157_v17 }
  0xc4   :  { %3287 = vmatpush3.msra.mxu1 %v1267_v34 }
  0xc5   :  { %3326 = vmatprep.subr.mxu1 %v4793_v20  ;;  %v159_v22 = vrot.slane %v103_v33, %v158_v41  ;;  %v163_v31 = vrot.slane %v103_v33, %v162_v61 }
 0x112   :  { %v269_v54 = vpop.f32.mrf.mxu0 }
 0x113   :  { %v270_v60 = vadd.f32 %v269_v54, %v159_v22 }
 0x114   :  { %v271_v28 = vpop.f32.mrf.mxu0 }
 0x115   :  { %v272_v56 = vadd.f32 %v271_v28, %v163_v31 }
 0x119   :  { %v501_v14 = vpop.f32.mrf.mxu1 }
 0x11a   :  { %v502_v10 = vadd.f32 %v501_v14, %v270_v60 }
 0x11b   :  { %v503_v0 = vpop.f32.mrf.mxu1 }
 0x11c   :  { %v504_v6 = vadd.f32 %v503_v0, %v272_v56 }
 0x132   :  { %v638_v46 = vpop.f32.mrf.mxu0 }
 0x133   :  { %v639_v20 = vadd.f32 %v638_v46, %v502_v10 }
 0x134   :  { %v640_v34 = vpop.f32.mrf.mxu0 }
 0x135   :  { %v641_v57 = vadd.f32 %v640_v34, %v504_v6 }
 0x13b   :  { %v744_v3 = vpop.f32.mrf.mxu1 }
 0x13c   :  { %v745_v37 = vadd.f32 %v744_v3, %v639_v20 }
 0x13d   :  { %v746_v32 = vpop.f32.mrf.mxu1 }
 0x13e   :  { %v747_v16 = vadd.f32 %v746_v32, %v641_v57 }
 0x154   :  { %v912_v47 = vpop.f32.mrf.mxu0 }
 0x155   :  { %v913_v17 = vadd.f32 %v912_v47, %v745_v37 }
 0x156   :  { %v914_v53 = vpop.f32.mrf.mxu0 }
 0x157   :  { %v915_v21 = vadd.f32 %v914_v53, %v747_v16 }
 0x15c   :  { %v1016_v41 = vpop.f32.mrf.mxu1 }
 0x15d   :  { %v1017_v4 = vadd.f32 %v1016_v41, %v913_v17 }
 0x15e   :  { %v1018_v61 = vpop.f32.mrf.mxu1 }
 0x15f   :  { %v1023_v33 = vmul.f32 0.044715, %v1017_v4  ;;  %v1019_v22 = vadd.f32 %v1018_v61, %v915_v21  ;;  %v1021_v32 = vmul.f32 0.5, %v1017_v4 }
 0x161   :  { %v1025_v54 = vmul.f32 %v1023_v33, %v1017_v4  ;;  %v1024_v28 = vmul.f32 0.044715, %v1019_v22  ;;  %v1022_v16 = vmul.f32 0.5, %v1019_v22 }
 0x163   :  { %v1027_v31 = vmul.f32 %v1025_v54, %v1017_v4  ;;  %v1026_v52 = vmul.f32 %v1024_v28, %v1019_v22  ;;  %v6246_v54 = vld [vmem:[#allocation10_spill] sm:$0xff] }
 0x164   :  { %v6247_v28 = vld [vmem:[#allocation22_spill] sm:$0xff] }
 0x165   :  { %v1029_v14 = vadd.f32 %v1027_v31, %v1017_v4  ;;  %v1028_v60 = vmul.f32 %v1026_v52, %v1019_v22  ;;  %v6248_v31 = vld [vmem:[#allocation11_spill] sm:$0xff] }
 0x167   :  { %v1031_v0 = vmul.f32 0.7978846, %v1029_v14  ;;  %v1030_v10 = vadd.f32 %v1028_v60, %v1019_v22  ;;  %v6245_v22 = vld [vmem:[#allocation16_spill] sm:$0xff]  ;;  %v6249_v14 = vld [vmem:[#allocation23_spill] sm:$0xff] }
 0x168   :  { %v6250_v60 = vld [vmem:[#allocation12_spill] sm:$0xff] }
 0x169   :  { %4064 = vtanh.f32 %v1031_v0  ;;  %v1032_v46 = vmul.f32 0.7978846, %v1030_v10  ;;  %v6251_v0 = vld [vmem:[#allocation27_spill] sm:$0xff]  ;;  %v6252_v10 = vld [vmem:[#allocation13_spill] sm:$0xff] }
 0x16b   :  { %4066 = vtanh.f32 %v1032_v46  ;;  %v6253_v46 = vld [vmem:[#allocation19_spill] sm:$0xff] }
 0x176   :  { %v4065_v20 = vpop.eup %4064 }
 0x177   :  { %v1035_v37 = vadd.f32 1.0, %v4065_v20  ;;  %v6254_v20 = vld [vmem:[#allocation14_spill] sm:$0xff] }
 0x178   :  { %v4067_v47 = vpop.eup %4066 }
 0x179   :  { %v1036_v53 = vadd.f32 1.0, %v4067_v47  ;;  %v1037_v57 = vmul.f32 %v1035_v37, %v1021_v32  ;;  %v6255_v32 = vld [vmem:[#allocation20_spill] sm:$0xff]  ;;  %v6256_v37 = vld [vmem:[#allocation15_spill] sm:$0xff]  ;;  %v6257_v47 = vld [vmem:[#allocation29_spill] sm:$0xff] }
 0x17b   :  { %v1038_v3 = vmul.f32 %v1036_v53, %v1022_v16  ;;  %v5118_v21 = vand.u32 4294901760, %v1037_v57  ;;  %v6258_v16 = vld [vmem:[#allocation17_spill] sm:$0xff]  ;;  %v6259_v53 = vld [vmem:[#allocation31_spill] sm:$0xff] }
 0x17d   :  { %v5120_v56 = vand.u32 4294901760, %v1038_v3  ;;  %v5123_v34 = vsub.f32 %v1037_v57, %v5118_v21  ;;  %v6260_v57 = vld [vmem:[#allocation21_spill] sm:$0xff] }
 0x17f   :  { %1382 = vmatprep.mubr.f32.mxu1 %v5120_v56  ;;  %v1142_v52 = vsub.f32 %v1038_v3, %v5120_v56  ;;  %v1149_v6 = vand.u32 4294901760, %v5123_v34  ;;  %v6261_v3 = vld [vmem:[#allocation33_spill] sm:$0xff] }
 0x180   :  { %1384 = vmatmul.mubr.f32.vlgmr.msra.gmra.mxu1 %v5118_v21 }
 0x181   :  { %3327 = vmatpush3.msra.mxu1 %v4795_v48  ;;  %v1143_v4 = vand.u32 4294901760, %v1142_v52  ;;  %v1150_v17 = vsub.f32 %v5123_v34, %v1149_v6 }
 0x182   :  { %3328 = vmatprep.subr.mxu1 %v4800_v1 }
 0x183   :  { %3329 = vmatpush3.msra.mxu1 %v4806_v15  ;;  %1626 = vmatprep.mubr.f32.mxu1 %v1143_v4  ;;  %v1144_v41 = vsub.f32 %v1142_v52, %v1143_v4  ;;  %v1151_v33 = vand.u32 4294901760, %v1150_v17  ;;  %v6263_v4 = vld [vmem:[#allocation9_spill] sm:$0xff]  ;;  %v6264_v17 = vld [vmem:[#allocation18_spill] sm:$0xff] }
 0x184   :  { %3330 = vmatprep.subr.mxu1 %v4813_v49 }
 0x185   :  { %3331 = vmatpush3.msra.mxu1 %v4820_v35  ;;  %v1145_v61 = vand.u32 4294901760, %v1144_v41  ;;  %v6265_v41 = vld [vmem:[#allocation28_spill] sm:$0xff] }
 0x186   :  { %3332 = vmatprep.subr.mxu1 %v4830_v40 }
 0x187   :  { %3333 = vmatpush3.msra.mxu1 %v4840_v19  ;;  %1146 = vmatprep.mubr.f32.mxu0 %v1145_v61  ;;  %v6266_v61 = vld [vmem:[#allocation26_spill] sm:$0xff] }
 0x188   :  { %3334 = vmatprep.subr.mxu1 %v4863_v11  ;;  %1152 = vmatmul.mubr.f32.vlgmr.msra.gmra.mxu0 %v1151_v33  ;;  %v6267_v33 = vld [vmem:[#allocation30_spill] sm:$0xff] }
 0x189   :  { %3292 = vmatpush3.msra.mxu0 %v4804_v42  ;;  %3335 = vmatpush3.msra.mxu1 %v4869_v23 }
 0x18a   :  { %3293 = vmatprep.subr.mxu0 %v4811_v38  ;;  %1519 = vmatprep.mubr.f32.mxu0 %v1142_v52  ;;  %v6262_v52 = vld [vmem:[#allocation25_spill] sm:$0xff] }
 0x18b   :  { %3336 = vmatprep.subr.mxu1 %v4877_v43  ;;  %3294 = vmatpush3.msra.mxu0 %v4818_v9 }
 0x18c   :  { %3337 = vmatpush3.msra.mxu1 %v4886_v8  ;;  %3295 = vmatprep.subr.mxu0 %v4828_v39 }
 0x18d   :  { %3338 = vmatprep.subr.mxu1 %v4893_v51  ;;  %3296 = vmatpush3.msra.mxu0 %v4838_v29 }
 0x18e   :  { %3339 = vmatpush3.msra.mxu1 %v4900_v62  ;;  %3297 = vmatprep.subr.mxu0 %v4848_v36 }
 0x18f   :  { %3340 = vmatprep.subr.mxu1 %v4910_v45  ;;  %3298 = vmatpush3.msra.mxu0 %v4856_v2 }
 0x190   :  { %3341 = vmatpush3.msra.mxu1 %v4920_v26  ;;  %3299 = vmatprep.subr.mxu0 %v4875_v13 }
 0x191   :  { %3342 = vmatprep.subr.mxu1 %v4943_v58  ;;  %3300 = vmatpush3.msra.mxu0 %v4884_v59 }
 0x192   :  { %3343 = vmatpush3.msra.mxu1 %v4949_v55  ;;  %3301 = vmatprep.subr.mxu0 %v4891_v63 }
 0x193   :  { %3344 = vmatprep.subr.mxu1 %v4957_v12  ;;  %3302 = vmatpush3.msra.mxu0 %v4898_v27 }
 0x194   :  { %3345 = vmatpush3.msra.mxu1 %v4966_v44  ;;  %3303 = vmatprep.subr.mxu0 %v4908_v7 }
 0x195   :  { %3346 = vmatprep.subr.mxu1 %v4973_v50  ;;  %3304 = vmatpush3.msra.mxu0 %v4918_v24 }
 0x196   :  { %3347 = vmatpush3.msra.mxu1 %v4980_v18  ;;  %3305 = vmatprep.subr.mxu0 %v4928_v5 }
 0x197   :  { %3348 = vmatprep.subr.mxu1 %v4990_v30  ;;  %3306 = vmatpush3.msra.mxu0 %v4936_v25 }
 0x198   :  { %3349 = vmatpush3.msra.mxu1 %v6245_v22  ;;  %3307 = vmatprep.subr.mxu0 %v6246_v54 }
 0x199   :  { %3350 = vmatprep.subr.mxu1 %v6247_v28  ;;  %3308 = vmatpush3.msra.mxu0 %v6248_v31 }
 0x19a   :  { %3351 = vmatpush3.msra.mxu1 %v6249_v14  ;;  %3309 = vmatprep.subr.mxu0 %v6250_v60 }
 0x19b   :  { %3352 = vmatprep.subr.mxu1 %v6251_v0  ;;  %3310 = vmatpush3.msra.mxu0 %v6252_v10 }
 0x19c   :  { %3353 = vmatpush3.msra.mxu1 %v6253_v46  ;;  %3311 = vmatprep.subr.mxu0 %v6254_v20 }
 0x19d   :  { %3354 = vmatprep.subr.mxu1 %v6255_v32  ;;  %3312 = vmatpush3.msra.mxu0 %v6256_v37 }
 0x19e   :  { %3355 = vmatpush3.msra.mxu1 %v6257_v47  ;;  %3313 = vmatprep.subr.mxu0 %v6258_v16 }
 0x19f   :  { %3356 = vmatprep.subr.mxu1 %v6259_v53  ;;  %3314 = vmatpush3.msra.mxu0 %v6260_v57 }
 0x1a0   :  { %3357 = vmatpush3.msra.mxu1 %v6261_v3  ;;  %3315 = vmatprep.subr.mxu0 %v6262_v52 }
 0x1a1   :  { %1630 = vmatmul.mubr.f32.vlgmr.msra.gmra.mxu1 %v1149_v6  ;;  %3396 = vmatprep.subr.mxu1 %v6263_v4  ;;  %v6268_v6 = vld [vmem:[#allocation32_spill] sm:$0xff]  ;;  %v6269_v4 = vld [vmem:[#allocation34_spill] sm:$0xff] }
 0x1a2   :  { %3316 = vmatpush3.msra.mxu0 %v6264_v17  ;;  %3397 = vmatpush3.msra.mxu1 %v4795_v48  ;;  %v6270_v48 = vld [vmem:[#allocation35_spill] sm:$0xff] }
 0x1a3   :  { %1900 = vmatprep.mubr.f32.mxu1 %v5120_v56  ;;  %3317 = vmatprep.subr.mxu0 %v6265_v41 }
 0x1a4   :  { %3398 = vmatprep.subr.mxu1 %v4800_v1  ;;  %3318 = vmatpush3.msra.mxu0 %v6266_v61  ;;  %v6271_v1 = vld [vmem:[#allocation24_spill] sm:$0xff] }
 0x1a5   :  { %3399 = vmatpush3.msra.mxu1 %v4806_v15  ;;  %3319 = vmatprep.subr.mxu0 %v6267_v33  ;;  %v6272_v15 = vand.u32 4294901760, %v6271_v1 }
 0x1a6   :  { %3400 = vmatprep.subr.mxu1 %v4813_v49  ;;  %3320 = vmatpush3.msra.mxu0 %v6268_v6  ;;  %v6273_v49 = vand.u32 4294901760, %v4804_v42  ;;  %v6277_v42 = vand.u32 4294901760, %v4838_v29  ;;  %v6281_v29 = vand.u32 4294901760, %v4884_v59  ;;  %v6288_v59 = vand.u32 4294901760, %v6246_v54  ;;  %v152_v54 = vld [vmem:[#allocation6 + $0x68] sm:$0xff] }
 0x1a7   :  { %3401 = vmatpush3.msra.mxu1 %v4820_v35  ;;  %3321 = vmatprep.subr.mxu0 %v6269_v4  ;;  %v6274_v35 = vand.u32 4294901760, %v4811_v38  ;;  %v6278_v38 = vand.u32 4294901760, %v4848_v36  ;;  %v6282_v36 = vand.u32 4294901760, %v4891_v63  ;;  %v6291_v63 = vand.u32 4294901760, %v6252_v10  ;;  %v148_v10 = vld [vmem:[#allocation6 + $0x48] sm:$0xff] }
 0x1a8   :  { %3402 = vmatprep.subr.mxu1 %v4830_v40  ;;  %3322 = vmatpush3.msra.mxu0 %v6270_v48  ;;  %v6275_v40 = vand.u32 4294901760, %v4818_v9  ;;  %v6279_v9 = vand.u32 4294901760, %v4856_v2  ;;  %v6283_v2 = vand.u32 4294901760, %v4898_v27  ;;  %v6293_v27 = vand.u32 4294901760, %v6256_v37 }
 0x1a9   :  { %3403 = vmatpush3.msra.mxu1 %v4840_v19  ;;  %1522 = vmatmul.mubr.f32.vlgmr.msra.gmra.mxu0 %v5123_v34  ;;  %v6276_v19 = vand.u32 4294901760, %v4828_v39  ;;  %v6280_v39 = vand.u32 4294901760, %v4875_v13  ;;  %v6286_v13 = vand.u32 4294901760, %v4928_v5  ;;  %v6299_v5 = vmov 0.0  }
 0x1aa   :  { %3361 = vmatprep.subr.mxu0 %v6272_v15  ;;  %3404 = vmatprep.subr.mxu1 %v4863_v11  ;;  %v6284_v11 = vand.u32 4294901760, %v4908_v7  ;;  %v6295_v7 = vand.u32 4294901760, %v6260_v57  ;;  %v5323_v37 = vand.u32 4294901760, %v148_v10 }
 0x1ab   :  { %3362 = vmatpush3.msra.mxu0 %v6273_v49  ;;  %1796 = vmatprep.mubr.f32.mxu0 %v5120_v56  ;;  %v153_v56 = vld [vmem:[#allocation6 + $0x70] sm:$0xff] }
 0x1ac   :  { %3405 = vmatpush3.msra.mxu1 %v4869_v23  ;;  %3363 = vmatprep.subr.mxu0 %v6274_v35  ;;  %v6285_v23 = vand.u32 4294901760, %v4918_v24  ;;  %v6297_v24 = vand.u32 4294901760, %v6264_v17  ;;  %v5345_v17 = vsub.f32 %v148_v10, %v5323_v37 }
 0x1ad   :  { %3406 = vmatprep.subr.mxu1 %v4877_v43  ;;  %3364 = vmatpush3.msra.mxu0 %v6275_v40  ;;  %v6287_v43 = vand.u32 4294901760, %v4936_v25  ;;  %v6300_v25 = vand.u32 4294901760, %v6266_v61 }
 0x1ae   :  { %3407 = vmatpush3.msra.mxu1 %v4886_v8  ;;  %3365 = vmatprep.subr.mxu0 %v6276_v19  ;;  %v6289_v8 = vand.u32 4294901760, %v6248_v31  ;;  %v150_v31 = vld [vmem:[#allocation6 + $0x58] sm:$0xff]  ;;  %v5376_v40 = vand.u32 4294901760, %v5345_v17 }
 0x1af   :  { %3408 = vmatprep.subr.mxu1 %v4893_v51  ;;  %3366 = vmatpush3.msra.mxu0 %v6277_v42  ;;  %v6292_v51 = vand.u32 4294901760, %v6254_v20 }
 0x1b0   :  { %3409 = vmatpush3.msra.mxu1 %v4900_v62  ;;  %3367 = vmatprep.subr.mxu0 %v6278_v38  ;;  %v6294_v62 = vand.u32 4294901760, %v6258_v16 }
 0x1b1   :  { %3410 = vmatprep.subr.mxu1 %v4910_v45  ;;  %3368 = vmatpush3.msra.mxu0 %v6279_v9  ;;  %v6296_v45 = vand.u32 4294901760, %v6262_v52  ;;  %v147_v9 = vld [vmem:[#allocation6 + $0x40] sm:$0xff] }
 0x1b2   :  { %3411 = vmatpush3.msra.mxu1 %v4920_v26  ;;  %3369 = vmatprep.subr.mxu0 %v6280_v39  ;;  %v6298_v26 = vand.u32 4294901760, %v6265_v41 }
 0x1b3   :  { %3412 = vmatprep.subr.mxu1 %v4943_v58  ;;  %3370 = vmatpush3.msra.mxu0 %v6281_v29  ;;  %v6301_v58 = vand.u32 4294901760, %v6267_v33  ;;  %v2044_v29 = vsub.f32 %v5345_v17, %v5376_v40 }
 0x1b4   :  { %3413 = vmatpush3.msra.mxu1 %v4949_v55  ;;  %3371 = vmatprep.subr.mxu0 %v6282_v36  ;;  %v6302_v55 = vand.u32 4294901760, %v6268_v6  ;;  %v5396_v36 = vand.u32 4294901760, %v147_v9 }
 0x1b5   :  { %3414 = vmatprep.subr.mxu1 %v4957_v12  ;;  %3372 = vmatpush3.msra.mxu0 %v6283_v2  ;;  %v6303_v12 = vand.u32 4294901760, %v6269_v4  ;;  %v146_v2 = vld [vmem:[#allocation6 + $0x38] sm:$0xff] }
 0x1b6   :  { %3415 = vmatpush3.msra.mxu1 %v4966_v44  ;;  %3373 = vmatprep.subr.mxu0 %v6284_v11  ;;  %v6304_v44 = vand.u32 4294901760, %v6270_v48 }
 0x1b7   :  { %3416 = vmatprep.subr.mxu1 %v4973_v50  ;;  %3374 = vmatpush3.msra.mxu0 %v6285_v23  ;;  %v154_v50 = vld [vmem:[#allocation6 + $0x78] sm:$0xff]  ;;  %v5405_v23 = vsub.f32 %v147_v9, %v5396_v36 }
 0x1b8   :  { %3417 = vmatpush3.msra.mxu1 %v4980_v18  ;;  %3375 = vmatprep.subr.mxu0 %v6286_v13  ;;  %v6290_v18 = vand.u32 4294901760, %v6250_v60  ;;  %v5407_v13 = vand.u32 4294901760, %v146_v2 }
 0x1b9   :  { %3418 = vmatprep.subr.mxu1 %v4990_v30  ;;  %3376 = vmatpush3.msra.mxu0 %v6287_v43  ;;  %v5299_v30 = vand.u32 4294901760, %v154_v50  ;;  %v145_v43 = vld [vmem:[#allocation6 + $0x30] sm:$0xff] }
 0x1ba   :  { %3419 = vmatpush3.msra.mxu1 %v6245_v22  ;;  %3377 = vmatprep.subr.mxu0 %v6288_v59  ;;  %v5304_v22 = vand.u32 4294901760, %v153_v56  ;;  %v5413_v59 = vand.u32 4294901760, %v2044_v29 }
 0x1bb   :  { %3420 = vmatprep.subr.mxu1 %v6247_v28  ;;  %3378 = vmatpush3.msra.mxu0 %v6289_v8  ;;  %v5302_v34 = vsub.f32 %v154_v50, %v5299_v30  ;;  %v151_v28 = vld [vmem:[#allocation6 + $0x60] sm:$0xff]  ;;  %v5416_v8 = vand.u32 4294901760, %v5405_v23 }
 0x1bc   :  { %3421 = vmatpush3.msra.mxu1 %v6249_v14  ;;  %3379 = vmatprep.subr.mxu0 %v6290_v18  ;;  %v5307_v14 = vand.u32 4294901760, %v152_v54  ;;  %v5309_v60 = vand.u32 4294901760, %v151_v28  ;;  %v5318_v20 = vsub.f32 %v153_v56, %v5304_v22  ;;  %6311 = vst [vmem:[#allocation27_spill] sm:$0xff] %v5413_v59  ;;  %v5419_v18 = vsub.f32 %v146_v2, %v5407_v13 }
 0x1bd   :  { %3422 = vmatprep.subr.mxu1 %v6251_v0  ;;  %3380 = vmatpush3.msra.mxu0 %v6291_v63  ;;  %v149_v0 = vld [vmem:[#allocation6 + $0x50] sm:$0xff]  ;;  %6312 = vst [vmem:[#allocation13_spill] sm:$0xff] %v5416_v8  ;;  %v5421_v63 = vand.u32 4294901760, %v145_v43 }
 0x1be   :  { %3423 = vmatpush3.msra.mxu1 %v6253_v46  ;;  %3381 = vmatprep.subr.mxu0 %v6292_v51  ;;  %v5315_v46 = vand.u32 4294901760, %v5302_v34  ;;  %v5329_v16 = vsub.f32 %v151_v28, %v5309_v60  ;;  %v144_v51 = vld [vmem:[#allocation6 + $0x28] sm:$0xff] }
 0x1bf   :  { %3424 = vmatprep.subr.mxu1 %v6255_v32  ;;  %3382 = vmatpush3.msra.mxu0 %v6293_v27  ;;  %v5321_v32 = vand.u32 4294901760, %v149_v0  ;;  %v2051_v27 = vsub.f32 %v5405_v23, %v5416_v8 }
 0x1c0   :  { %3425 = vmatpush3.msra.mxu1 %v6257_v47  ;;  %3383 = vmatprep.subr.mxu0 %v6294_v62  ;;  %v5326_v47 = vsub.f32 %v152_v54, %v5307_v14  ;;  %v2002_v57 = vsub.f32 %v5302_v34, %v5315_v46  ;;  %v5351_v61 = vand.u32 4294901760, %v5329_v16  ;;  %v5430_v62 = vand.u32 4294901760, %v5419_v18 }
 0x1c1   :  { %3426 = vmatprep.subr.mxu1 %v6259_v53  ;;  %3384 = vmatpush3.msra.mxu0 %v6295_v7  ;;  %v5341_v52 = vsub.f32 %v149_v0, %v5321_v32  ;;  %v5433_v7 = vsub.f32 %v145_v43, %v5421_v63  ;;  %v141_v0 = vld [vmem:[#allocation6 + $0x10] sm:$0xff] }
 0x1c2   :  { %3427 = vmatpush3.msra.mxu1 %v6261_v3  ;;  %3385 = vmatprep.subr.mxu0 %v6296_v45  ;;  %v5338_v3 = vand.u32 4294901760, %v5318_v20  ;;  %v5348_v41 = vand.u32 4294901760, %v5326_v47  ;;  %v5357_v6 = vand.u32 4294901760, %v2002_v57  ;;  %v2023_v15 = vsub.f32 %v5329_v16, %v5351_v61  ;;  %6313 = vst [vmem:[#allocation19_spill] sm:$0xff] %v5430_v62 }
 0x1c3   :  { %1902 = vmatmul.mubr.f32.vlgmr.msra.gmra.mxu1 %v5118_v21  ;;  %3386 = vmatpush3.msra.mxu0 %v6297_v24  ;;  %v5362_v48 = vand.u32 4294901760, %v5341_v52  ;;  %v5435_v45 = vand.u32 4294901760, %v144_v51  ;;  %v143_v24 = vld [vmem:[#allocation6 + $0x20] sm:$0xff] }
 0x1c4   :  { %3387 = vmatprep.subr.mxu0 %v6298_v26  ;;  %3670 = vmatprep.subr.mxu1 %v6299_v5  ;;  %6305 = vst [vmem:[#allocation16_spill] sm:$0xff] %v5357_v6  ;;  %v2009_v4 = vsub.f32 %v5318_v20, %v5338_v3  ;;  %v2016_v1 = vsub.f32 %v5326_v47, %v5348_v41  ;;  %v5384_v42 = vand.u32 4294901760, %v2023_v15  ;;  %v5441_v26 = vand.u32 4294901760, %v2051_v27 }
 0x1c5   :  { %3388 = vmatpush3.msra.mxu0 %v6300_v25  ;;  %3671 = vmatpush3.msra.mxu1 %v5357_v6  ;;  %v2037_v38 = vsub.f32 %v5341_v52, %v5362_v48  ;;  %v2058_v25 = vsub.f32 %v5419_v18, %v5430_v62 }
 0x1c6   :  { %3389 = vmatprep.subr.mxu0 %v6301_v58  ;;  %v5371_v49 = vand.u32 4294901760, %v2009_v4  ;;  %3672 = vmatprep.subr.mxu1 %v6299_v5  ;;  %v5380_v19 = vand.u32 4294901760, %v2016_v1  ;;  %6308 = vst [vmem:[#allocation11_spill] sm:$0xff] %v5384_v42  ;;  %6314 = vst [vmem:[#allocation14_spill] sm:$0xff] %v5441_v26  ;;  %v5446_v58 = vand.u32 4294901760, %v5433_v7  ;;  %v5479_v1 = vand.u32 4294901760, %v141_v0 }
 0x1c7   :  { %3390 = vmatpush3.msra.mxu0 %v6302_v55  ;;  %v5402_v11 = vand.u32 4294901760, %v2037_v38  ;;  %v5449_v55 = vsub.f32 %v144_v51, %v5435_v45  ;;  %v5457_v50 = vand.u32 4294901760, %v2058_v25  ;;  %v139_v51 = vld [vmem:[#allocation6] sm:$0xff]  ;;  %3702 = vmatprep.mubr.msk.f32.mxu1 %vm4142_vm0, %v6299_v5 }
 0x1c8   :  { %3391 = vmatprep.subr.mxu0 %v6303_v12  ;;  %6306 = vst [vmem:[#allocation10_spill] sm:$0xff] %v5371_v49  ;;  %6307 = vst [vmem:[#allocation22_spill] sm:$0xff] %v5380_v19  ;;  %3673 = vmatpush3.msra.mxu1 %v5371_v49  ;;  %v5453_v12 = vand.u32 4294901760, %v143_v24  ;;  %v2065_v56 = vsub.f32 %v5433_v7, %v5446_v58  ;;  %v5494_v29 = vsub.f32 %v141_v0, %v5479_v1 }
 0x1c9   :  { %3392 = vmatpush3.msra.mxu0 %v6304_v44  ;;  %3674 = vmatprep.subr.mxu1 %v6299_v5  ;;  %6310 = vst [vmem:[#allocation12_spill] sm:$0xff] %v5402_v11  ;;  %6315 = vst [vmem:[#allocation20_spill] sm:$0xff] %v5446_v58  ;;  %v142_v44 = vld [vmem:[#allocation6 + $0x18] sm:$0xff]  ;;  %v5462_v54 = vand.u32 4294901760, %v5449_v55 }
 0x1ca   :  { %1798 = vmatmul.mubr.f32.vlgmr.msra.gmra.mxu0 %v5118_v21  ;;  %3635 = vmatprep.subr.mxu0 %v6299_v5  ;;  %v5311_v21 = vand.u32 4294901760, %v150_v31  ;;  %6316 = vst [vmem:[#allocation15_spill] sm:$0xff] %v5457_v50  ;;  %v5464_v28 = vand.u32 4294901760, %v142_v44  ;;  %v5472_v10 = vand.u32 4294901760, %v2065_v56 }
 0x1cb   :  { %3636 = vmatpush3.msra.mxu0 %v5299_v30  ;;  %3675 = vmatpush3.msra.mxu1 %v5380_v19  ;;  %6317 = vst [vmem:[#allocation29_spill] sm:$0xff] %v5462_v54  ;;  %v2072_v57 = vsub.f32 %v5449_v55, %v5462_v54 }
 0x1cc   :  { %3637 = vmatprep.subr.mxu0 %v6299_v5  ;;  %v5332_v53 = vsub.f32 %v150_v31, %v5311_v21  ;;  %3676 = vmatprep.subr.mxu1 %v6299_v5  ;;  %v5468_v31 = vsub.f32 %v143_v24, %v5453_v12  ;;  %6318 = vst [vmem:[#allocation17_spill] sm:$0xff] %v5472_v10  ;;  %v5507_v24 = vand.u32 4294901760, %v5494_v29 }
 0x1cd   :  { %3638 = vmatpush3.msra.mxu0 %v5304_v22  ;;  %3677 = vmatpush3.msra.mxu1 %v5384_v42  ;;  %v5477_v4 = vsub.f32 %v142_v44, %v5464_v28  ;;  %v5488_v38 = vand.u32 4294901760, %v2072_v57  ;;  %v5512_v44 = vand.u32 4294901760, %v139_v51 }
 0x1ce   :  { %3639 = vmatprep.subr.mxu0 %v6299_v5  ;;  %v5354_v33 = vand.u32 4294901760, %v5332_v53  ;;  %3678 = vmatprep.subr.mxu1 %v6299_v5  ;;  %v5484_v15 = vand.u32 4294901760, %v5468_v31  ;;  %6322 = vst [vmem:[#allocation25_spill] sm:$0xff] %v5507_v24  ;;  %v2093_v57 = vsub.f32 %v5494_v29, %v5507_v24 }
 0x1cf   :  { %3640 = vmatpush3.msra.mxu0 %v5307_v14  ;;  %6320 = vst [vmem:[#allocation21_spill] sm:$0xff] %v5488_v38  ;;  %v5491_v9 = vand.u32 4294901760, %v5477_v4  ;;  %3667 = vmatprep.mubr.msk.f32.mxu0 %vm4142_vm0, %v6299_v5 }
 0x1d0   :  { %3641 = vmatprep.subr.mxu0 %v6299_v5  ;;  %v2030_v35 = vsub.f32 %v5332_v53, %v5354_v33  ;;  %6319 = vst [vmem:[#allocation31_spill] sm:$0xff] %v5484_v15  ;;  %v2079_v43 = vsub.f32 %v5468_v31, %v5484_v15 }
 0x1d1   :  { %3642 = vmatpush3.msra.mxu0 %v5309_v60  ;;  %6321 = vst [vmem:[#allocation33_spill] sm:$0xff] %v5491_v9  ;;  %v2086_v27 = vsub.f32 %v5477_v4, %v5491_v9 }
 0x1d2   :  { %3643 = vmatprep.subr.mxu0 %v6299_v5  ;;  %v5392_v39 = vand.u32 4294901760, %v2030_v35  ;;  %v140_v35 = vld [vmem:[#allocation6 + $0x8] sm:$0xff]  ;;  %v5516_v56 = vand.u32 4294901760, %v2079_v43  ;;  %v5533_v43 = vand.u32 4294901760, %v2093_v57 }
 0x1d3   :  { %3644 = vmatpush3.msra.mxu0 %v5311_v21  ;;  %v5496_v2 = vand.u32 4294901760, %v140_v35  ;;  %v5519_v0 = vand.u32 4294901760, %v2086_v27 }
 0x1d4   :  { %3645 = vmatprep.subr.mxu0 %v6299_v5  ;;  %6309 = vst [vmem:[#allocation23_spill] sm:$0xff] %v5392_v39  ;;  %3679 = vmatpush3.msra.mxu1 %v5392_v39  ;;  %6323 = vst [vmem:[#allocation9_spill] sm:$0xff] %v5516_v56 }
 0x1d5   :  { %3646 = vmatpush3.msra.mxu0 %v5321_v32  ;;  %3680 = vmatprep.subr.mxu1 %v6299_v5  ;;  %v5510_v25 = vsub.f32 %v140_v35, %v5496_v2  ;;  %6324 = vst [vmem:[#allocation18_spill] sm:$0xff] %v5519_v0  ;;  %v5527_v35 = vsub.f32 %v139_v51, %v5512_v44  ;;  %6326 = vst [vmem:[#allocation26_spill] sm:$0xff] %v5533_v43 }
 0x1d6   :  { %3647 = vmatprep.subr.mxu0 %v6299_v5  ;;  %3681 = vmatpush3.msra.mxu1 %v5402_v11 }
 0x1d7   :  { %3648 = vmatpush3.msra.mxu0 %v5323_v37  ;;  %3682 = vmatprep.subr.mxu1 %v6299_v5 }
 0x1d8   :  { %3649 = vmatprep.subr.mxu0 %v6299_v5  ;;  %3683 = vmatpush3.msra.mxu1 %v5413_v59  ;;  %v3218_v59 = vld [vmem:[%s5946_s4] ss:$0 sm:$0xff] }
 0x1d9   :  { %3650 = vmatpush3.msra.mxu0 %v5396_v36  ;;  %3684 = vmatprep.subr.mxu1 %v6299_v5 }
 0x1da   :  { %3651 = vmatprep.subr.mxu0 %v6299_v5  ;;  %3685 = vmatpush3.msra.mxu1 %v5441_v26 }
 0x1db   :  { %3652 = vmatpush3.msra.mxu0 %v5407_v13  ;;  %3686 = vmatprep.subr.mxu1 %v6299_v5 }
 0x1dc   :  { %3653 = vmatprep.subr.mxu0 %v6299_v5  ;;  %3687 = vmatpush3.msra.mxu1 %v5457_v50 }
 0x1dd   :  { %3654 = vmatpush3.msra.mxu0 %v5421_v63  ;;  %3688 = vmatprep.subr.mxu1 %v6299_v5 }
 0x1de   :  { %3655 = vmatprep.subr.mxu0 %v6299_v5  ;;  %3689 = vmatpush3.msra.mxu1 %v5472_v10  ;;  %v5538_v10 = vand.u32 4294901760, %v5527_v35 }
 0x1df   :  { %3656 = vmatpush3.msra.mxu0 %v5435_v45  ;;  %3690 = vmatprep.subr.mxu1 %v6299_v5 }
 0x1e0   :  { %3657 = vmatprep.subr.mxu0 %v6299_v5  ;;  %3691 = vmatpush3.msra.mxu1 %v5488_v38  ;;  %v5524_v38 = vand.u32 4294901760, %v5510_v25  ;;  %6327 = vst [vmem:[#allocation30_spill] sm:$0xff] %v5538_v10 }
 0x1e1   :  { %3658 = vmatpush3.msra.mxu0 %v5453_v12  ;;  %3692 = vmatprep.subr.mxu1 %v6299_v5 }
 0x1e2   :  { %3659 = vmatprep.subr.mxu0 %v6299_v5  ;;  %6325 = vst [vmem:[#allocation28_spill] sm:$0xff] %v5524_v38  ;;  %3693 = vmatpush3.msra.mxu1 %v5516_v56  ;;  %v2100_v27 = vsub.f32 %v5510_v25, %v5524_v38  ;;  %v2107_v56 = vsub.f32 %v5527_v35, %v5538_v10 }
 0x1e3   :  { %3660 = vmatpush3.msra.mxu0 %v5464_v28  ;;  %3694 = vmatprep.subr.mxu1 %v6299_v5 }
 0x1e4   :  { %3661 = vmatprep.subr.mxu0 %v6299_v5  ;;  %3695 = vmatpush3.msra.mxu1 %v5519_v0  ;;  %v5543_v51 = vand.u32 4294901760, %v2100_v27  ;;  %v5549_v57 = vand.u32 4294901760, %v2107_v56 }
 0x1e5   :  { %3662 = vmatpush3.msra.mxu0 %v5479_v1  ;;  %3696 = vmatprep.subr.mxu1 %v6299_v5 }
 0x1e6   :  { %3663 = vmatprep.subr.mxu0 %v6299_v5  ;;  %6328 = vst [vmem:[#allocation32_spill] sm:$0xff] %v5543_v51  ;;  %3697 = vmatpush3.msra.mxu1 %v5533_v43  ;;  %6329 = vst [vmem:[#allocation34_spill] sm:$0xff] %v5549_v57 }
 0x1e7   :  { %3664 = vmatpush3.msra.mxu0 %v5496_v2  ;;  %3698 = vmatprep.subr.mxu1 %v6299_v5 }
 0x1e8   :  { %3665 = vmatprep.subr.mxu0 %v6299_v5  ;;  %3699 = vmatpush3.msra.mxu1 %v5543_v51 }
 0x1e9   :  { %3666 = vmatpush3.msra.mxu0 %v5512_v44  ;;  %3700 = vmatprep.subr.mxu1 %v6299_v5 }
 0x1ea   :  { %3705 = vmatprep.subr.mxu0 %v6299_v5  ;;  %3701 = vmatpush3.msra.mxu1 %v5549_v57 }
 0x1eb   :  { %3740 = vmatprep.subr.mxu1 %v6299_v5 }
 0x240   :  { %v3288_v43 = vpop.f32.mrf.mxu1 }
 0x242   :  { %v3289_v26 = vpop.f32.mrf.mxu1 }
 0x243   :  { %v3290_v42 = vadd.f32 %v3289_v26, %v3288_v43  ;;  %v6333_v26 = vld [vmem:[#allocation29_spill] sm:$0xff]  ;;  %v6342_v43 = vld [vmem:[#allocation11_spill] sm:$0xff] }
 0x248   :  { %v3253_v27 = vpop.f32.mrf.mxu0 }
 0x24a   :  { %v3254_v0 = vpop.f32.mrf.mxu0 }
 0x24b   :  { %v3255_v50 = vadd.f32 %v3254_v0, %v3253_v27 }
 0x24d   :  { %v1154_v39 = vadd.f32 %v3255_v50, %v3218_v59  ;;  %v6332_v59 = vld [vmem:[#allocation20_spill] sm:$0xff]  ;;  %v6335_v50 = vld [vmem:[#allocation33_spill] sm:$0xff] }
 0x24f   :  { %v1386_v38 = vadd.f32 %v3290_v42, %v1154_v39  ;;  %v6330_v39 = vld [vmem:[#allocation13_spill] sm:$0xff] }
 0x261   :  { %v3358_v51 = vpop.f32.mrf.mxu1 }
 0x263   :  { %v3359_v19 = vpop.f32.mrf.mxu1 }
 0x264   :  { %v3360_v6 = vadd.f32 %v3359_v19, %v3358_v51  ;;  %v6343_v51 = vld [vmem:[#allocation23_spill] sm:$0xff] }
 0x269   :  { %v3323_v56 = vpop.f32.mrf.mxu0 }
 0x26b   :  { %v3324_v11 = vpop.f32.mrf.mxu0 }
 0x26c   :  { %v3325_v10 = vadd.f32 %v3324_v11, %v3323_v56  ;;  %v6331_v11 = vld [vmem:[#allocation19_spill] sm:$0xff]  ;;  %v6346_v56 = vld [vmem:[#allocation14_spill] sm:$0xff] }
 0x26e   :  { %v1524_v49 = vadd.f32 %v3325_v10, %v1386_v38  ;;  %v6337_v10 = vld [vmem:[#allocation25_spill] sm:$0xff]  ;;  %v6339_v38 = vld [vmem:[#allocation28_spill] sm:$0xff] }
 0x270   :  { %v1632_v54 = vadd.f32 %v3360_v6, %v1524_v49 }
 0x283   :  { %v3428_v57 = vpop.f32.mrf.mxu1 }
 0x285   :  { %v3429_v9 = vpop.f32.mrf.mxu1 }
 0x286   :  { %v3430_v27 = vadd.f32 %v3429_v9, %v3428_v57  ;;  %v6340_v9 = vld [vmem:[#allocation22_spill] sm:$0xff]  ;;  %v6344_v57 = vld [vmem:[#allocation12_spill] sm:$0xff] }
 0x28a   :  { %v3393_v24 = vpop.f32.mrf.mxu0 }
 0x28c   :  { %v3394_v15 = vpop.f32.mrf.mxu0 }
 0x28d   :  { %v3395_v0 = vadd.f32 %v3394_v15, %v3393_v24  ;;  %v6338_v15 = vld [vmem:[#allocation10_spill] sm:$0xff] }
 0x28e   :  { %v6341_v24 = vld [vmem:[#allocation30_spill] sm:$0xff] }
 0x28f   :  { %v1800_v58 = vadd.f32 %v3395_v0, %v1632_v54  ;;  %v6336_v54 = vld [vmem:[#allocation16_spill] sm:$0xff]  ;;  %v6347_v0 = vld [vmem:[#allocation15_spill] sm:$0xff] }
 0x291   :  { %v5562_v62 = vadd.f32 %v3430_v27, %v1800_v58  ;;  %v6334_v58 = vld [vmem:[#allocation31_spill] sm:$0xff]  ;;  %v6348_v27 = vld [vmem:[#allocation17_spill] sm:$0xff] }
 0x293   :  { %v5565_v8 = vand.u32 4294901760, %v5562_v62 }
 0x295   :  { %3703 = vmatmul.mubr.f32.vlgmr.msra.gmra.mxu1 %v5565_v8  ;;  %v5570_v42 = vsub.f32 %v5562_v62, %v5565_v8 }
 0x296   :  { %3741 = vmatpush3.msra.mxu1 %v5299_v30  ;;  %3772 = vmatprep.mubr.msk.f32.mxu1 %vm4142_vm0, %v6299_v5 }
 0x297   :  { %3742 = vmatprep.subr.mxu1 %v6299_v5  ;;  %v1990_v6 = vand.u32 4294901760, %v5570_v42 }
 0x298   :  { %3743 = vmatpush3.msra.mxu1 %v5304_v22 }
 0x299   :  { %3744 = vmatprep.subr.mxu1 %v6299_v5  ;;  %v1991_v49 = vsub.f32 %v5570_v42, %v1990_v6 }
 0x29a   :  { %3745 = vmatpush3.msra.mxu1 %v5307_v14 }
 0x29b   :  { %3746 = vmatprep.subr.mxu1 %v6299_v5  ;;  %v1992_v19 = vand.u32 4294901760, %v1991_v49  ;;  %v6350_v49 = vld [vmem:[#allocation9_spill] sm:$0xff] }
 0x29c   :  { %3747 = vmatpush3.msra.mxu1 %v5309_v60 }
 0x29d   :  { %3748 = vmatprep.subr.mxu1 %v6299_v5  ;;  %3668 = vmatmul.mubr.f32.vlgmr.msra.gmra.mxu0 %v1992_v19 }
 0x29e   :  { %3706 = vmatpush3.msra.mxu0 %v5302_v34  ;;  %3749 = vmatpush3.msra.mxu1 %v5311_v21 }
 0x29f   :  { %3707 = vmatprep.subr.mxu0 %v6299_v5  ;;  %3750 = vmatprep.subr.mxu1 %v6299_v5 }
 0x2a0   :  { %3708 = vmatpush3.msra.mxu0 %v5318_v20  ;;  %3751 = vmatpush3.msra.mxu1 %v5321_v32 }
 0x2a1   :  { %3709 = vmatprep.subr.mxu0 %v6299_v5  ;;  %3752 = vmatprep.subr.mxu1 %v6299_v5 }
 0x2a2   :  { %3710 = vmatpush3.msra.mxu0 %v5326_v47  ;;  %3753 = vmatpush3.msra.mxu1 %v5323_v37 }
 0x2a3   :  { %3711 = vmatprep.subr.mxu0 %v6299_v5  ;;  %3754 = vmatprep.subr.mxu1 %v6299_v5 }
 0x2a4   :  { %3712 = vmatpush3.msra.mxu0 %v5329_v16  ;;  %3755 = vmatpush3.msra.mxu1 %v5396_v36 }
 0x2a5   :  { %3713 = vmatprep.subr.mxu0 %v6299_v5  ;;  %3756 = vmatprep.subr.mxu1 %v6299_v5 }
 0x2a6   :  { %3714 = vmatpush3.msra.mxu0 %v5332_v53  ;;  %3757 = vmatpush3.msra.mxu1 %v5407_v13 }
 0x2a7   :  { %3715 = vmatprep.subr.mxu0 %v6299_v5  ;;  %3758 = vmatprep.subr.mxu1 %v6299_v5 }
 0x2a8   :  { %3716 = vmatpush3.msra.mxu0 %v5341_v52  ;;  %3759 = vmatpush3.msra.mxu1 %v5421_v63 }
 0x2a9   :  { %3717 = vmatprep.subr.mxu0 %v6299_v5  ;;  %3760 = vmatprep.subr.mxu1 %v6299_v5 }
 0x2aa   :  { %3718 = vmatpush3.msra.mxu0 %v5345_v17  ;;  %3761 = vmatpush3.msra.mxu1 %v5435_v45 }
 0x2ab   :  { %3719 = vmatprep.subr.mxu0 %v6299_v5  ;;  %3762 = vmatprep.subr.mxu1 %v6299_v5 }
 0x2ac   :  { %3720 = vmatpush3.msra.mxu0 %v5405_v23  ;;  %3763 = vmatpush3.msra.mxu1 %v5453_v12 }
 0x2ad   :  { %3721 = vmatprep.subr.mxu0 %v6299_v5  ;;  %3764 = vmatprep.subr.mxu1 %v6299_v5 }
 0x2ae   :  { %3722 = vmatpush3.msra.mxu0 %v5419_v18  ;;  %3765 = vmatpush3.msra.mxu1 %v5464_v28 }
 0x2af   :  { %3723 = vmatprep.subr.mxu0 %v6299_v5  ;;  %3766 = vmatprep.subr.mxu1 %v6299_v5 }
 0x2b0   :  { %3724 = vmatpush3.msra.mxu0 %v5433_v7  ;;  %3767 = vmatpush3.msra.mxu1 %v5479_v1 }
 0x2b1   :  { %3725 = vmatprep.subr.mxu0 %v6299_v5  ;;  %3768 = vmatprep.subr.mxu1 %v6299_v5 }
 0x2b2   :  { %3726 = vmatpush3.msra.mxu0 %v5449_v55  ;;  %3769 = vmatpush3.msra.mxu1 %v5496_v2 }
 0x2b3   :  { %3727 = vmatprep.subr.mxu0 %v6299_v5  ;;  %3770 = vmatprep.subr.mxu1 %v6299_v5 }
 0x2b4   :  { %3728 = vmatpush3.msra.mxu0 %v5468_v31  ;;  %3771 = vmatpush3.msra.mxu1 %v5512_v44 }
 0x2b5   :  { %3729 = vmatprep.subr.mxu0 %v6299_v5  ;;  %3773 = vmatmul.mubr.f32.vlgmr.msra.gmra.mxu1 %v1990_v6  ;;  %v6349_v6 = vld [vmem:[#allocation21_spill] sm:$0xff] }
 0x2b6   :  { %3810 = vmatprep.subr.mxu1 %v6299_v5  ;;  %3730 = vmatpush3.msra.mxu0 %v5477_v4 }
 0x2b7   :  { %3811 = vmatpush3.msra.mxu1 %v5299_v30  ;;  %3731 = vmatprep.subr.mxu0 %v6299_v5 }
 0x2b8   :  { %3812 = vmatprep.subr.mxu1 %v6299_v5  ;;  %3732 = vmatpush3.msra.mxu0 %v5494_v29 }
 0x2b9   :  { %3813 = vmatpush3.msra.mxu1 %v5304_v22  ;;  %3733 = vmatprep.subr.mxu0 %v6299_v5 }
 0x2ba   :  { %3814 = vmatprep.subr.mxu1 %v6299_v5  ;;  %3734 = vmatpush3.msra.mxu0 %v5510_v25 }
 0x2bb   :  { %3815 = vmatpush3.msra.mxu1 %v5307_v14  ;;  %3735 = vmatprep.subr.mxu0 %v6299_v5 }
 0x2bc   :  { %3816 = vmatprep.subr.mxu1 %v6299_v5  ;;  %3736 = vmatpush3.msra.mxu0 %v5527_v35 }
 0x2bd   :  { %3737 = vmatprep.mubr.msk.f32.mxu0 %vm4142_vm0, %v6299_v5  ;;  %3817 = vmatpush3.msra.mxu1 %v5309_v60 }
 0x2be   :  { %3738 = vmatmul.mubr.f32.vlgmr.msra.gmra.mxu0 %v5570_v42  ;;  %3775 = vmatprep.subr.mxu0 %v6299_v5  ;;  %v2548_v42 = vmul.f32 %v5562_v62, %v5562_v62 }
 0x2bf   :  { %3818 = vmatprep.subr.mxu1 %v6299_v5  ;;  %3776 = vmatpush3.msra.mxu0 %v5315_v46 }
 0x2c0   :  { %3819 = vmatpush3.msra.mxu1 %v5311_v21  ;;  %3777 = vmatprep.subr.mxu0 %v6299_v5  ;;  %v5754_v19 = vand.u32 4294901760, %v2548_v42 }
 0x2c1   :  { %3820 = vmatprep.subr.mxu1 %v6299_v5  ;;  %3778 = vmatpush3.msra.mxu0 %v5338_v3 }
 0x2c2   :  { %3821 = vmatpush3.msra.mxu1 %v5321_v32  ;;  %3779 = vmatprep.subr.mxu0 %v6299_v5 }
 0x2c3   :  { %3822 = vmatprep.subr.mxu1 %v6299_v5  ;;  %3780 = vmatpush3.msra.mxu0 %v5348_v41 }
 0x2c4   :  { %3823 = vmatpush3.msra.mxu1 %v5323_v37  ;;  %3781 = vmatprep.subr.mxu0 %v6299_v5 }
 0x2c5   :  { %3824 = vmatprep.subr.mxu1 %v6299_v5  ;;  %3782 = vmatpush3.msra.mxu0 %v5351_v61 }
 0x2c6   :  { %3825 = vmatpush3.msra.mxu1 %v5396_v36  ;;  %3783 = vmatprep.subr.mxu0 %v6299_v5 }
 0x2c7   :  { %3826 = vmatprep.subr.mxu1 %v6299_v5  ;;  %3784 = vmatpush3.msra.mxu0 %v5354_v33 }
 0x2c8   :  { %3827 = vmatpush3.msra.mxu1 %v5407_v13  ;;  %3785 = vmatprep.subr.mxu0 %v6299_v5 }
 0x2c9   :  { %3828 = vmatprep.subr.mxu1 %v6299_v5  ;;  %3786 = vmatpush3.msra.mxu0 %v5362_v48 }
 0x2ca   :  { %3829 = vmatpush3.msra.mxu1 %v5421_v63  ;;  %3787 = vmatprep.subr.mxu0 %v6299_v5 }
 0x2cb   :  { %3830 = vmatprep.subr.mxu1 %v6299_v5  ;;  %3788 = vmatpush3.msra.mxu0 %v5376_v40 }
 0x2cc   :  { %3831 = vmatpush3.msra.mxu1 %v5435_v45  ;;  %3789 = vmatprep.subr.mxu0 %v6299_v5 }
 0x2cd   :  { %3832 = vmatprep.subr.mxu1 %v6299_v5  ;;  %3790 = vmatpush3.msra.mxu0 %v6330_v39 }
 0x2ce   :  { %3833 = vmatpush3.msra.mxu1 %v5453_v12  ;;  %3791 = vmatprep.subr.mxu0 %v6299_v5 }
 0x2cf   :  { %3834 = vmatprep.subr.mxu1 %v6299_v5  ;;  %3792 = vmatpush3.msra.mxu0 %v6331_v11 }
 0x2d0   :  { %3835 = vmatpush3.msra.mxu1 %v5464_v28  ;;  %3793 = vmatprep.subr.mxu0 %v6299_v5 }
 0x2d1   :  { %3836 = vmatprep.subr.mxu1 %v6299_v5  ;;  %3794 = vmatpush3.msra.mxu0 %v6332_v59 }
 0x2d2   :  { %3837 = vmatpush3.msra.mxu1 %v5479_v1  ;;  %3795 = vmatprep.subr.mxu0 %v6299_v5 }
 0x2d3   :  { %3838 = vmatprep.subr.mxu1 %v6299_v5  ;;  %3796 = vmatpush3.msra.mxu0 %v6333_v26 }
 0x2d4   :  { %3839 = vmatpush3.msra.mxu1 %v5496_v2  ;;  %3797 = vmatprep.subr.mxu0 %v6299_v5 }
 0x2d5   :  { %3840 = vmatprep.subr.mxu1 %v6299_v5  ;;  %3798 = vmatpush3.msra.mxu0 %v6334_v58 }
 0x2d6   :  { %3841 = vmatpush3.msra.mxu1 %v5512_v44  ;;  %3842 = vmatprep.mubr.msk.f32.mxu1 %vm4142_vm0, %v6299_v5 }
 0x2d7   :  { %3799 = vmatprep.subr.mxu0 %v6299_v5  ;;  %3843 = vmatmul.mubr.f32.vlgmr.msra.gmra.mxu1 %v5565_v8 }
 0x2d8   :  { %3880 = vmatprep.subr.mxu1 %v6299_v5  ;;  %3800 = vmatpush3.msra.mxu0 %v6335_v50 }
 0x2d9   :  { %3881 = vmatpush3.msra.mxu1 %v6336_v54  ;;  %3801 = vmatprep.subr.mxu0 %v6299_v5  ;;  %v6351_v54 = vld [vmem:[#allocation18_spill] sm:$0xff] }
 0x2da   :  { %3882 = vmatprep.subr.mxu1 %v6299_v5  ;;  %3802 = vmatpush3.msra.mxu0 %v6337_v10 }
 0x2db   :  { %3883 = vmatpush3.msra.mxu1 %v6338_v15  ;;  %3803 = vmatprep.subr.mxu0 %v6299_v5  ;;  %v6352_v15 = vld [vmem:[#allocation26_spill] sm:$0xff] }
 0x2dc   :  { %3884 = vmatprep.subr.mxu1 %v6299_v5  ;;  %3804 = vmatpush3.msra.mxu0 %v6339_v38 }
 0x2dd   :  { %3885 = vmatpush3.msra.mxu1 %v6340_v9  ;;  %3805 = vmatprep.subr.mxu0 %v6299_v5  ;;  %v5765_v9 = vsub.f32 %v2548_v42, %v5754_v19 }
 0x2de   :  { %3886 = vmatprep.subr.mxu1 %v6299_v5  ;;  %3806 = vmatpush3.msra.mxu0 %v6341_v24 }
 0x2df   :  { %3807 = vmatprep.mubr.msk.f32.mxu0 %vm4142_vm0, %v6299_v5  ;;  %3887 = vmatpush3.msra.mxu1 %v6342_v43  ;;  %v6353_v43 = vld [vmem:[#allocation32_spill] sm:$0xff] }
 0x2e0   :  { %3808 = vmatmul.mubr.f32.vlgmr.msra.gmra.mxu0 %v5565_v8  ;;  %3845 = vmatprep.subr.mxu0 %v6299_v5  ;;  %v6345_v8 = vld [vmem:[#allocation27_spill] sm:$0xff] }
 0x2e1   :  { %3888 = vmatprep.subr.mxu1 %v6299_v5  ;;  %3846 = vmatpush3.msra.mxu0 %v5299_v30 }
 0x2e2   :  { %3889 = vmatpush3.msra.mxu1 %v6343_v51  ;;  %3847 = vmatprep.subr.mxu0 %v6299_v5  ;;  %v6354_v51 = vld [vmem:[#allocation34_spill] sm:$0xff] }
 0x2e3   :  { %3890 = vmatprep.subr.mxu1 %v6299_v5  ;;  %3848 = vmatpush3.msra.mxu0 %v5304_v22 }
 0x2e4   :  { %3891 = vmatpush3.msra.mxu1 %v6344_v57  ;;  %3849 = vmatprep.subr.mxu0 %v6299_v5  ;;  %v2632_v57 = vand.u32 4294901760, %v5765_v9 }
 0x2e5   :  { %3892 = vmatprep.subr.mxu1 %v6299_v5  ;;  %3850 = vmatpush3.msra.mxu0 %v5307_v14 }
 0x2e6   :  { %3893 = vmatpush3.msra.mxu1 %v6345_v8  ;;  %3851 = vmatprep.subr.mxu0 %v6299_v5  ;;  %v2633_v8 = vsub.f32 %v5765_v9, %v2632_v57 }
 0x2e7   :  { %3894 = vmatprep.subr.mxu1 %v6299_v5  ;;  %3852 = vmatpush3.msra.mxu0 %v5309_v60 }
 0x2e8   :  { %3895 = vmatpush3.msra.mxu1 %v6346_v56  ;;  %3853 = vmatprep.subr.mxu0 %v6299_v5  ;;  %v2634_v56 = vand.u32 4294901760, %v2633_v8 }
 0x2e9   :  { %3896 = vmatprep.subr.mxu1 %v6299_v5  ;;  %3854 = vmatpush3.msra.mxu0 %v5311_v21 }
 0x2ea   :  { %3897 = vmatpush3.msra.mxu1 %v6347_v0  ;;  %3855 = vmatprep.subr.mxu0 %v6299_v5 }
 0x2eb   :  { %3898 = vmatprep.subr.mxu1 %v6299_v5  ;;  %3856 = vmatpush3.msra.mxu0 %v5321_v32 }
 0x2ec   :  { %3899 = vmatpush3.msra.mxu1 %v6348_v27  ;;  %3857 = vmatprep.subr.mxu0 %v6299_v5 }
 0x2ed   :  { %3900 = vmatprep.subr.mxu1 %v6299_v5  ;;  %3858 = vmatpush3.msra.mxu0 %v5323_v37 }
 0x2ee   :  { %3901 = vmatpush3.msra.mxu1 %v6349_v6  ;;  %3859 = vmatprep.subr.mxu0 %v6299_v5 }
 0x2ef   :  { %3902 = vmatprep.subr.mxu1 %v6299_v5  ;;  %3860 = vmatpush3.msra.mxu0 %v5396_v36 }
 0x2f0   :  { %3903 = vmatpush3.msra.mxu1 %v6350_v49  ;;  %3861 = vmatprep.subr.mxu0 %v6299_v5 }
 0x2f1   :  { %3904 = vmatprep.subr.mxu1 %v6299_v5  ;;  %3862 = vmatpush3.msra.mxu0 %v5407_v13 }
 0x2f2   :  { %3905 = vmatpush3.msra.mxu1 %v6351_v54  ;;  %3863 = vmatprep.subr.mxu0 %v6299_v5 }
 0x2f3   :  { %3906 = vmatprep.subr.mxu1 %v6299_v5  ;;  %3864 = vmatpush3.msra.mxu0 %v5421_v63 }
 0x2f4   :  { %3907 = vmatpush3.msra.mxu1 %v6352_v15  ;;  %3865 = vmatprep.subr.mxu0 %v6299_v5 }
 0x2f5   :  { %3908 = vmatprep.subr.mxu1 %v6299_v5  ;;  %3866 = vmatpush3.msra.mxu0 %v5435_v45 }
 0x2f6   :  { %3909 = vmatpush3.msra.mxu1 %v6353_v43  ;;  %3867 = vmatprep.subr.mxu0 %v6299_v5 }
 0x2f7   :  { %3910 = vmatprep.subr.mxu1 %v6299_v5  ;;  %3868 = vmatpush3.msra.mxu0 %v5453_v12 }
 0x2f8   :  { %3911 = vmatpush3.msra.mxu1 %v6354_v51  ;;  %3912 = vmatprep.mubr.msk.f32.mxu1 %vm4142_vm0, %v6299_v5 }
 0x2f9   :  { %3869 = vmatprep.subr.mxu0 %v6299_v5  ;;  %3913 = vmatmul.mubr.f32.vlgmr.msra.gmra.mxu1 %v5754_v19 }
 0x2fa   :  { %3950 = vmatprep.subr.mxu1 %v6299_v5  ;;  %3870 = vmatpush3.msra.mxu0 %v5464_v28 }
 0x2fb   :  { %3951 = vmatpush3.msra.mxu1 %v5299_v30  ;;  %3871 = vmatprep.subr.mxu0 %v6299_v5 }
 0x2fc   :  { %3952 = vmatprep.subr.mxu1 %v6299_v5  ;;  %3872 = vmatpush3.msra.mxu0 %v5479_v1 }
 0x2fd   :  { %3953 = vmatpush3.msra.mxu1 %v5304_v22  ;;  %3873 = vmatprep.subr.mxu0 %v6299_v5 }
 0x2fe   :  { %3954 = vmatprep.subr.mxu1 %v6299_v5  ;;  %3874 = vmatpush3.msra.mxu0 %v5496_v2 }
 0x2ff   :  { %3955 = vmatpush3.msra.mxu1 %v5307_v14  ;;  %3875 = vmatprep.subr.mxu0 %v6299_v5 }
 0x300   :  { %3956 = vmatprep.subr.mxu1 %v6299_v5  ;;  %3876 = vmatpush3.msra.mxu0 %v5512_v44 }
 0x301   :  { %3877 = vmatprep.mubr.msk.f32.mxu0 %vm4142_vm0, %v6299_v5  ;;  %3957 = vmatpush3.msra.mxu1 %v5309_v60 }
 0x302   :  { %3878 = vmatmul.mubr.f32.vlgmr.msra.gmra.mxu0 %v2634_v56  ;;  %3915 = vmatprep.subr.mxu0 %v6299_v5 }
 0x303   :  { %3958 = vmatprep.subr.mxu1 %v6299_v5  ;;  %3916 = vmatpush3.msra.mxu0 %v5302_v34 }
 0x304   :  { %3959 = vmatpush3.msra.mxu1 %v5311_v21  ;;  %3917 = vmatprep.subr.mxu0 %v6299_v5 }
 0x305   :  { %3960 = vmatprep.subr.mxu1 %v6299_v5  ;;  %3918 = vmatpush3.msra.mxu0 %v5318_v20 }
 0x306   :  { %3961 = vmatpush3.msra.mxu1 %v5321_v32  ;;  %3919 = vmatprep.subr.mxu0 %v6299_v5 }
 0x307   :  { %3962 = vmatprep.subr.mxu1 %v6299_v5  ;;  %3920 = vmatpush3.msra.mxu0 %v5326_v47 }
 0x308   :  { %3963 = vmatpush3.msra.mxu1 %v5323_v37  ;;  %3921 = vmatprep.subr.mxu0 %v6299_v5 }
 0x309   :  { %3964 = vmatprep.subr.mxu1 %v6299_v5  ;;  %3922 = vmatpush3.msra.mxu0 %v5329_v16 }
 0x30a   :  { %3965 = vmatpush3.msra.mxu1 %v5396_v36  ;;  %3923 = vmatprep.subr.mxu0 %v6299_v5 }
 0x30b   :  { %3966 = vmatprep.subr.mxu1 %v6299_v5  ;;  %3924 = vmatpush3.msra.mxu0 %v5332_v53 }
 0x30c   :  { %3967 = vmatpush3.msra.mxu1 %v5407_v13  ;;  %3925 = vmatprep.subr.mxu0 %v6299_v5 }
 0x30d   :  { %3968 = vmatprep.subr.mxu1 %v6299_v5  ;;  %3926 = vmatpush3.msra.mxu0 %v5341_v52 }
 0x30e   :  { %3969 = vmatpush3.msra.mxu1 %v5421_v63  ;;  %3927 = vmatprep.subr.mxu0 %v6299_v5 }
 0x30f   :  { %3970 = vmatprep.subr.mxu1 %v6299_v5  ;;  %3928 = vmatpush3.msra.mxu0 %v5345_v17 }
 0x310   :  { %3971 = vmatpush3.msra.mxu1 %v5435_v45  ;;  %3929 = vmatprep.subr.mxu0 %v6299_v5 }
 0x311   :  { %3972 = vmatprep.subr.mxu1 %v6299_v5  ;;  %3930 = vmatpush3.msra.mxu0 %v5405_v23 }
 0x312   :  { %3973 = vmatpush3.msra.mxu1 %v5453_v12  ;;  %3931 = vmatprep.subr.mxu0 %v6299_v5 }
 0x313   :  { %3974 = vmatprep.subr.mxu1 %v6299_v5  ;;  %3932 = vmatpush3.msra.mxu0 %v5419_v18 }
 0x314   :  { %3975 = vmatpush3.msra.mxu1 %v5464_v28  ;;  %3933 = vmatprep.subr.mxu0 %v6299_v5 }
 0x315   :  { %3976 = vmatprep.subr.mxu1 %v6299_v5  ;;  %3934 = vmatpush3.msra.mxu0 %v5433_v7 }
 0x316   :  { %3977 = vmatpush3.msra.mxu1 %v5479_v1  ;;  %3935 = vmatprep.subr.mxu0 %v6299_v5 }
 0x317   :  { %3978 = vmatprep.subr.mxu1 %v6299_v5  ;;  %3936 = vmatpush3.msra.mxu0 %v5449_v55 }
 0x318   :  { %3979 = vmatpush3.msra.mxu1 %v5496_v2  ;;  %3937 = vmatprep.subr.mxu0 %v6299_v5 }
 0x319   :  { %3980 = vmatprep.subr.mxu1 %v6299_v5  ;;  %3938 = vmatpush3.msra.mxu0 %v5468_v31 }
 0x31a   :  { %3981 = vmatpush3.msra.mxu1 %v5512_v44  ;;  %3982 = vmatprep.mubr.msk.f32.mxu1 %vm4142_vm0, %v6299_v5 }
 0x31b   :  { %3939 = vmatprep.subr.mxu0 %v6299_v5  ;;  %3983 = vmatmul.mubr.f32.vlgmr.msra.gmra.mxu1 %v2632_v57 }
 0x31c   :  { %4020 = vmatprep.subr.mxu1 %v6299_v5  ;;  %3940 = vmatpush3.msra.mxu0 %v5477_v4 }
 0x31d   :  { %4021 = vmatpush3.msra.mxu1 %v5299_v30  ;;  %3941 = vmatprep.subr.mxu0 %v6299_v5 }
 0x31e   :  { %4022 = vmatprep.subr.mxu1 %v6299_v5  ;;  %3942 = vmatpush3.msra.mxu0 %v5494_v29 }
 0x31f   :  { %4023 = vmatpush3.msra.mxu1 %v5304_v22  ;;  %3943 = vmatprep.subr.mxu0 %v6299_v5 }
 0x320   :  { %4024 = vmatprep.subr.mxu1 %v6299_v5  ;;  %3944 = vmatpush3.msra.mxu0 %v5510_v25 }
 0x321   :  { %4025 = vmatpush3.msra.mxu1 %v5307_v14  ;;  %3945 = vmatprep.subr.mxu0 %v6299_v5 }
 0x322   :  { %4026 = vmatprep.subr.mxu1 %v6299_v5  ;;  %3946 = vmatpush3.msra.mxu0 %v5527_v35 }
 0x323   :  { %3947 = vmatprep.mubr.msk.f32.mxu0 %vm4142_vm0, %v6299_v5  ;;  %4027 = vmatpush3.msra.mxu1 %v5309_v60 }
 0x324   :  { %3948 = vmatmul.mubr.f32.vlgmr.msra.gmra.mxu0 %v5765_v9  ;;  %3985 = vmatprep.subr.mxu0 %v6299_v5 }
 0x325   :  { %4028 = vmatprep.subr.mxu1 %v6299_v5  ;;  %3986 = vmatpush3.msra.mxu0 %v5315_v46 }
 0x326   :  { %4029 = vmatpush3.msra.mxu1 %v5311_v21  ;;  %3987 = vmatprep.subr.mxu0 %v6299_v5 }
 0x327   :  { %4030 = vmatprep.subr.mxu1 %v6299_v5  ;;  %3988 = vmatpush3.msra.mxu0 %v5338_v3 }
 0x328   :  { %4031 = vmatpush3.msra.mxu1 %v5321_v32  ;;  %3989 = vmatprep.subr.mxu0 %v6299_v5 }
 0x329   :  { %4032 = vmatprep.subr.mxu1 %v6299_v5  ;;  %3990 = vmatpush3.msra.mxu0 %v5348_v41 }
 0x32a   :  { %4033 = vmatpush3.msra.mxu1 %v5323_v37  ;;  %3991 = vmatprep.subr.mxu0 %v6299_v5 }
 0x32b   :  { %4034 = vmatprep.subr.mxu1 %v6299_v5  ;;  %3992 = vmatpush3.msra.mxu0 %v5351_v61 }
 0x32c   :  { %4035 = vmatpush3.msra.mxu1 %v5396_v36  ;;  %3993 = vmatprep.subr.mxu0 %v6299_v5 }
 0x32d   :  { %4036 = vmatprep.subr.mxu1 %v6299_v5  ;;  %3994 = vmatpush3.msra.mxu0 %v5354_v33 }
 0x32e   :  { %4037 = vmatpush3.msra.mxu1 %v5407_v13  ;;  %3995 = vmatprep.subr.mxu0 %v6299_v5 }
 0x32f   :  { %4038 = vmatprep.subr.mxu1 %v6299_v5  ;;  %3996 = vmatpush3.msra.mxu0 %v5362_v48 }
 0x330   :  { %4039 = vmatpush3.msra.mxu1 %v5421_v63  ;;  %3997 = vmatprep.subr.mxu0 %v6299_v5 }
 0x331   :  { %4040 = vmatprep.subr.mxu1 %v6299_v5  ;;  %3998 = vmatpush3.msra.mxu0 %v5376_v40 }
 0x332   :  { %4041 = vmatpush3.msra.mxu1 %v5435_v45  ;;  %3999 = vmatprep.subr.mxu0 %v6299_v5 }
 0x333   :  { %4042 = vmatprep.subr.mxu1 %v6299_v5  ;;  %4000 = vmatpush3.msra.mxu0 %v6330_v39  ;;  %v3219_v39 = vld [vmem:[%s5947_s5] ss:$0 sm:$0xff] }
 0x334   :  { %4043 = vmatpush3.msra.mxu1 %v5453_v12  ;;  %4001 = vmatprep.subr.mxu0 %v6299_v5 }
 0x335   :  { %4044 = vmatprep.subr.mxu1 %v6299_v5  ;;  %4002 = vmatpush3.msra.mxu0 %v6331_v11 }
 0x336   :  { %4045 = vmatpush3.msra.mxu1 %v5464_v28  ;;  %4003 = vmatprep.subr.mxu0 %v6299_v5 }
 0x337   :  { %4046 = vmatprep.subr.mxu1 %v6299_v5  ;;  %4004 = vmatpush3.msra.mxu0 %v6332_v59  ;;  %v3220_v59 = vld [vmem:[%s5948_s6] ss:$0 sm:$0xff] }
 0x338   :  { %4047 = vmatpush3.msra.mxu1 %v5479_v1  ;;  %4005 = vmatprep.subr.mxu0 %v6299_v5 }
 0x339   :  { %4048 = vmatprep.subr.mxu1 %v6299_v5  ;;  %4006 = vmatpush3.msra.mxu0 %v6333_v26 }
 0x33a   :  { %4049 = vmatpush3.msra.mxu1 %v5496_v2  ;;  %4007 = vmatprep.subr.mxu0 %v6299_v5 }
 0x33b   :  { %4050 = vmatprep.subr.mxu1 %v6299_v5  ;;  %4008 = vmatpush3.msra.mxu0 %v6334_v58 }
 0x33c   :  { %4051 = vmatpush3.msra.mxu1 %v5512_v44  ;;  %4052 = vmatprep.mubr.msk.f32.mxu1 %vm4142_vm0, %v6299_v5 }
 0x33d   :  { %4009 = vmatprep.subr.mxu0 %v6299_v5  ;;  %4053 = vmatmul.mubr.f32.vlgmr.msra.gmra.mxu1 %v5754_v19 }
 0x33e   :  { %4010 = vmatpush3.msra.mxu0 %v6335_v50  ;;  %4017 = vmatprep.mubr.msk.f32.mxu0 %vm4142_vm0, %v6299_v5 }
 0x33f   :  { %4011 = vmatprep.subr.mxu0 %v6299_v5 }
 0x340   :  { %4012 = vmatpush3.msra.mxu0 %v6337_v10 }
 0x341   :  { %4013 = vmatprep.subr.mxu0 %v6299_v5 }
 0x342   :  { %4014 = vmatpush3.msra.mxu0 %v6339_v38 }
 0x343   :  { %4015 = vmatprep.subr.mxu0 %v6299_v5 }
 0x344   :  { %4016 = vmatpush3.msra.mxu0 %v6341_v24 }
 0x345   :  { %4018 = vmatmul.mubr.f32.vlgmr.msra.gmra.mxu0 %v5754_v19 }
 0x355   :  { %v2145_v30 = vpop.f32.mrf.mxu1 }
 0x357   :  { %v3704_v34 = vpop.f32.mrf.mxu1 }
 0x35d   :  { %v1994_v22 = vpop.f32.mrf.mxu0 }
 0x35e   :  { %v2146_v14 = vadd.f32 %v2145_v30, %v1994_v22 }
 0x35f   :  { %v3669_v60 = vpop.f32.mrf.mxu0 }
 0x375   :  { %v2338_v21 = vpop.f32.mrf.mxu1 }
 0x377   :  { %v3774_v46 = vpop.f32.mrf.mxu1 }
 0x37e   :  { %v2249_v20 = vpop.f32.mrf.mxu0 }
 0x37f   :  { %v2250_v32 = vadd.f32 %v2249_v20, %v2146_v14 }
 0x380   :  { %v3739_v37 = vpop.f32.mrf.mxu0 }
 0x381   :  { %v2339_v47 = vadd.f32 %v2338_v21, %v2250_v32 }
 0x397   :  { %v2544_v16 = vpop.f32.mrf.mxu1 }
 0x399   :  { %v3844_v53 = vpop.f32.mrf.mxu1 }
 0x3a0   :  { %v2457_v3 = vpop.f32.mrf.mxu0 }
 0x3a1   :  { %v2458_v52 = vadd.f32 %v2457_v3, %v2339_v47 }
 0x3a2   :  { %v3809_v5 = vpop.f32.mrf.mxu0 }
 0x3a3   :  { %v2545_v17 = vadd.f32 %v2544_v16, %v2458_v52 }
 0x3a5   :  { %v3190_v4 = vmul.f32 %v2545_v17, %v2545_v17  ;;  %v3193_v44 = vsub.f32 %v5562_v62, %v2545_v17 }
 0x3b9   :  { %v2787_v41 = vpop.f32.mrf.mxu1 }
 0x3bb   :  { %v3914_v61 = vpop.f32.mrf.mxu1 }
 0x3c2   :  { %v2636_v33 = vpop.f32.mrf.mxu0 }
 0x3c3   :  { %v2788_v63 = vadd.f32 %v2787_v41, %v2636_v33 }
 0x3c4   :  { %v3879_v48 = vpop.f32.mrf.mxu0 }
 0x3db   :  { %v2980_v40 = vpop.f32.mrf.mxu1 }
 0x3dd   :  { %v3984_v36 = vpop.f32.mrf.mxu1 }
 0x3e4   :  { %v2891_v23 = vpop.f32.mrf.mxu0 }
 0x3e5   :  { %v2892_v45 = vadd.f32 %v2891_v23, %v2788_v63 }
 0x3e6   :  { %v3949_v13 = vpop.f32.mrf.mxu0 }
 0x3e7   :  { %v2981_v55 = vadd.f32 %v2980_v40, %v2892_v45 }
 0x3fd   :  { %v3186_v18 = vpop.f32.mrf.mxu1 }
 0x3ff   :  { %v4054_v7 = vpop.f32.mrf.mxu1 }
 0x405   :  { %v3099_v12 = vpop.f32.mrf.mxu0 }
 0x406   :  { %v3100_v28 = vadd.f32 %v3099_v12, %v2981_v55 }
 0x407   :  { %v4019_v31 = vpop.f32.mrf.mxu0 }
 0x408   :  { %v3187_v1 = vadd.f32 %v3186_v18, %v3100_v28 }
 0x40a   :  { %v3191_v29 = vsub.f32 %v3187_v1, %v3190_v4 }
 0x40c   :  { %v3192_v2 = vmax.f32 %v3191_v29, 0.0 }
 0x40e   :  { %v3194_v25 = vadd.f32 1e-05, %v3192_v2 }
 0x410   :  { %4068 = vrsqrt.f32 %v3194_v25 }
 0x41d   :  { %v4069_v35 = vpop.eup %4068 }
 0x41e   :  { %v3196_v11 = vmul.f32 %v4069_v35, %v3193_v44 }
 0x420   :  { %v3203_v26 = vmul.f32 %v3219_v39, %v3196_v11 }
 0x422   :  { %v3210_v58 = vadd.f32 %v3220_v59, %v3203_v26 }
 0x424   :  { %3211 = vst [vmem:[%s5950_s8] sm:$0xf] %v3210_v58 }
 0x425   :  { %3216 = vsyncpa [#allocation3], 1 }
 0x426   :  { %3217 = vsyncpa [#allocation5], 1 }

</bundles_post_ra>
